<compile_context>
chip_gen: v5e
topology: v5e:2x2
jax: 0.10.0
libtpu: 0.0.40
codegen_flags: <defaults>
</compile_context>

<pallas_src>
import functools

import jax
import jax.numpy as jnp
from jax.experimental import pallas as pl
from jax.experimental.pallas import tpu as pltpu


def _default_vmem_limit_bytes():
    """Generation-aware scoped-VMEM limit (~3/4 of physical, conservative fallback)."""
    try:
        cap = int(pltpu.get_tpu_info().vmem_capacity_bytes)  # 128 MiB v5e/v6e, 64 MiB v7x
    except Exception:
        cap = 64 << 20                                        # conservative (v7x)
    return min(cap * 3 // 4, 100 << 20)


def _choose_block_b(B, L, R, enc_itemsize, vmem_limit_bytes):
    """Pick the batch block so the encoder tile is a few MiB, TB % 8 == 0,
    and (when B allows it) there are >= 2 grid steps for v7x megacore sharding."""
    if B <= 8:
        return B
    # Budget: 2x enc block (double buffer) + ~2x f32 temps + small blocks + weights.
    target = min(4 << 20, max(1 << 20, vmem_limit_bytes // 12))
    rows = max(8, target // max(1, L * R * enc_itemsize))
    tb = int(min(B, rows))
    tb -= tb % 8
    tb = max(8, tb)
    if pl.cdiv(B, tb) < 2:
        half = (B + 1) // 2
        tb = max(8, ((half + 7) // 8) * 8)
        while tb > 8 and pl.cdiv(B, tb) < 2:
            tb -= 8
    return tb


def _attention_kernel(*refs, use_mask):
    if use_mask:
        hidden_ref, enc_ref, mask_ref, w_ref, b_ref, out_ref = refs
    else:
        hidden_ref, enc_ref, w_ref, b_ref, out_ref = refs
        mask_ref = None

    # Encoder tile (TB, L, R); upcast once to f32 for both contractions
    # (no-op when stored f32; bf16 storage only halves the HBM traffic).
    enc = enc_ref[...].astype(jnp.float32)
    h = hidden_ref[...]                                              # (TB, R) f32

    # Single folded projection: q = h @ (W_ip^T @ W_attn) + b_ip @ W_attn
    q = jnp.dot(h, w_ref[...], preferred_element_type=jnp.float32) + b_ref[...]  # (TB, R)

    # scores[b, l] = q[b, :] . enc[b, l, :]
    # VPU multiply + lane reduce: no per-step transpose of the big enc tile,
    # no degenerate M=1 batched MXU matmuls.
    s = jnp.sum(q[:, None, :] * enc, axis=-1)                        # (TB, L)

    # Numerically-stable softmax with the optional mask fused into a single
    # normalization (exactly equals softmax -> *mask -> renormalize).
    s = s - jnp.max(s, axis=-1, keepdims=True)
    e = jnp.exp(s)
    if use_mask:
        e = e * mask_ref[...]
    denom = jnp.sum(e, axis=-1, keepdims=True)                       # (TB, 1)
    w = e / denom                                                    # exact divide (cheap)

    # att_res[b, :] = sum_l w[b, l] * enc[b, l, :]   (VPU + sublane reduce)
    out_ref[...] = jnp.sum(w[:, :, None] * enc, axis=1).astype(out_ref.dtype)


def attention_forward(hidden, encoder_outputs, params, encoder_mask=None,
                      *, block_b=None, enc_compute_dtype=None):
    """hidden: (B, R); encoder_outputs: (B, L, R); encoder_mask: (B, >=L) or None."""
    B, R = hidden.shape
    Be, L, R2 = encoder_outputs.shape
    assert Be == B and R2 == R

    enc = encoder_outputs
    if enc_compute_dtype is not None:
        enc = enc.astype(enc_compute_dtype)          # e.g. bf16 halves enc HBM traffic

    use_mask = encoder_mask is not None

    # Fold the two Linear layers into one (R, R) projection (mathematically exact):
    #   q = (h @ W_ip^T + b_ip) @ W_attn = h @ (W_ip^T @ W_attn) + b_ip @ W_attn
    # b_attn only shifts all scores of a row by the same constant -> cancels in softmax.
    hi = jax.lax.Precision.HIGHEST
    w_ip = params["w_ip"].astype(jnp.float32)        # (H, R) torch Linear layout (out, in)
    w_attn = params["w_attn"].astype(jnp.float32)    # (H, R)
    w_comb = jnp.dot(w_ip.T, w_attn, precision=hi)                          # (R, R)
    b_comb = jnp.dot(params["b_ip"].astype(jnp.float32), w_attn,
                     precision=hi).reshape(1, R)                            # (1, R)

    vmem_limit = _default_vmem_limit_bytes()
    enc_itemsize = jnp.dtype(enc.dtype).itemsize
    TB = block_b if block_b is not None else _choose_block_b(B, L, R, enc_itemsize, vmem_limit)
    TB = min(TB, B)
    grid_b = pl.cdiv(B, TB)

    inputs = [hidden.astype(jnp.float32), enc]
    in_specs = [
        pl.BlockSpec((TB, R), lambda b: (b, 0)),          # hidden rows
        pl.BlockSpec((TB, L, R), lambda b: (b, 0, 0)),    # encoder rows (dominant DMA)
    ]
    if use_mask:
        # NOTE: for bandwidth-critical cases the mask could stay bool/int8 on HBM
        # and be widened in-kernel; f32 keeps layouts simple and it is tiny vs enc.
        inputs.append(encoder_mask[:, :L].astype(jnp.float32))
        in_specs.append(pl.BlockSpec((TB, L), lambda b: (b, 0)))
    inputs += [w_comb, b_comb]

    kernel = functools.partial(_attention_kernel, use_mask=use_mask)

    # TODO(synk): if production R is not a multiple of 128, pad R (or transpose so
    # B lies on lanes) to avoid masked vst.msk partial stores on the (TB, R) output.
    def build(single_buffer_weights):
        if single_buffer_weights:
            # Constant index_map -> fetched once; single-buffer to reclaim VMEM.
            w_specs = [
                pl.BlockSpec((R, R), lambda b: (0, 0), pipeline_mode=pl.Buffered(1)),
                pl.BlockSpec((1, R), lambda b: (0, 0), pipeline_mode=pl.Buffered(1)),
            ]
        else:
            w_specs = [
                pl.BlockSpec((R, R), lambda b: (0, 0)),
                pl.BlockSpec((1, R), lambda b: (0, 0)),
            ]
        return pl.pallas_call(
            kernel,
            out_shape=jax.ShapeDtypeStruct((B, R), jnp.float32),
            grid_spec=pltpu.PrefetchScalarGridSpec(
                num_scalar_prefetch=0,
                grid=(grid_b,),
                in_specs=in_specs + w_specs,
                out_specs=pl.BlockSpec((TB, R), lambda b: (b, 0)),
            ),
            compiler_params=pltpu.CompilerParams(
                # batch axis is independent -> shards across v7x's two TensorCores
                # (harmless on single-TC v5e/v6e); raised scoped-VMEM limit lets
                # the double-buffered enc blocks reach the chosen size.
                dimension_semantics=("parallel",),
                vmem_limit_bytes=vmem_limit,
            ),
        )

    try:
        return build(True)(*inputs)
    except Exception:
        # Fallback if this jax build rejects pl.Buffered(1) single-buffered
        # weight specs; only buffering (VMEM footprint) differs, not results.
        return build(False)(*inputs)


def attention_reference(hidden, encoder_outputs, params, encoder_mask=None):
    """Pure-JAX reference mirroring the PyTorch forward (uses b_attn explicitly)."""
    B, L, R = encoder_outputs.shape
    hp = hidden @ params["w_ip"].T + params["b_ip"]                # (B, H)
    en = encoder_outputs @ params["w_attn"].T + params["b_attn"]   # (B, L, H)
    scores = jnp.einsum("bh,blh->bl", hp, en)                      # (B, L)
    w = jax.nn.softmax(scores, axis=1)
    if encoder_mask is not None:
        m = encoder_mask[:, :L].astype(jnp.float32)
        w = w * m
        w = w / jnp.sum(w, axis=1, keepdims=True)
    return jnp.einsum("bl,blr->br", w, encoder_outputs)


def init_params(key, rnn_size, hidden_size):
    k1, k2, k3, k4 = jax.random.split(key, 4)
    bound = 1.0 / jnp.sqrt(rnn_size)
    return {
        "w_attn": jax.random.uniform(k1, (hidden_size, rnn_size),
                                     jnp.float32, -bound, bound),
        "b_attn": jax.random.uniform(k2, (hidden_size,),
                                     jnp.float32, -bound, bound),
        "w_ip": jax.random.uniform(k3, (hidden_size, rnn_size),
                                   jnp.float32, -bound, bound),
        "b_ip": jax.random.uniform(k4, (hidden_size,),
                                   jnp.float32, -bound, bound),
    }


if __name__ == "__main__":
    B, L, RNN, HID = 32, 8, 32, 16   # auto-TB -> 16 rows/step, 2 grid steps

    key = jax.random.PRNGKey(0)
    k_h, k_e, k_m, k_p = jax.random.split(key, 4)

    hidden = jax.random.normal(k_h, (B, RNN), jnp.float32)
    encoder_outputs = jax.random.normal(k_e, (B, L, RNN), jnp.float32)
    encoder_mask = (jax.random.uniform(k_m, (B, L)) > 0.3).astype(jnp.float32)
    params = init_params(k_p, RNN, HID)

    # path 1: no mask, f32
    out = attention_forward(hidden, encoder_outputs, params, None)
    jax.block_until_ready(out)
    ref = attention_reference(hidden, encoder_outputs, params, None)
    assert jnp.allclose(out, ref, atol=5e-3, rtol=5e-3), "no-mask mismatch"

    # path 2: with encoder_mask, f32
    out_m = attention_forward(hidden, encoder_outputs, params, encoder_mask)
    jax.block_until_ready(out_m)
    ref_m = attention_reference(hidden, encoder_outputs, params, encoder_mask)
    assert jnp.allclose(out_m, ref_m, atol=5e-3, rtol=5e-3), "mask mismatch"

    # path 3: bf16 encoder_outputs storage (memory-bound regime), loose tolerance
    out_bf = attention_forward(hidden, encoder_outputs, params, encoder_mask,
                               enc_compute_dtype=jnp.bfloat16)
    jax.block_until_ready(out_bf)
    assert jnp.allclose(out_bf, ref_m, atol=5e-2, rtol=5e-2), "bf16 mismatch"

    # path 4: small batch (TB collapses to B) still works
    out_s = attention_forward(hidden[:2], encoder_outputs[:2], params, None)
    jax.block_until_ready(out_s)
    ref_s = attention_reference(hidden[:2], encoder_outputs[:2], params, None)
    assert jnp.allclose(out_s, ref_s, atol=5e-3, rtol=5e-3), "small-batch mismatch"

    print("KERNEL_OK")
</pallas_src>

<mosaic_0001>
module attributes {stable_mosaic.version = 11 : i64} {
  func.func @_attention_kernel(%arg0: i32, %arg1: memref<16x32xf32, #tpu.memory_space<vmem>>, %arg2: memref<16x8x32xf32, #tpu.memory_space<vmem>>, %arg3: memref<32x32xf32, #tpu.memory_space<vmem>>, %arg4: memref<1x32xf32, #tpu.memory_space<vmem>>, %arg5: memref<16x32xf32, #tpu.memory_space<vmem>>) attributes {dimension_semantics = [#tpu.dimension_semantics<parallel>], iteration_bounds = array<i64: 2>, scalar_prefetch = 0 : i64, scratch_operands = 0 : i64, tpu.core_type = #tpu.core_type<tc>, window_params = [{transform_indices = @transform_0, window_bounds = array<i64: 16, 32>}, {transform_indices = @transform_1, window_bounds = array<i64: 16, 8, 32>}, {pipeline_mode = #tpu.pipeline_mode<synchronous>, transform_indices = @transform_2, window_bounds = array<i64: 32, 32>}, {pipeline_mode = #tpu.pipeline_mode<synchronous>, transform_indices = @transform_3, window_bounds = array<i64: 1, 32>}, {transform_indices = @transform_4, window_bounds = array<i64: 16, 32>}]} {
    %c0 = arith.constant 0 : index
    %c0_0 = arith.constant 0 : index
    %c0_1 = arith.constant 0 : index
    %0 = vector.load %arg2[%c0, %c0_0, %c0_1] : memref<16x8x32xf32, #tpu.memory_space<vmem>>, vector<16x8x32xf32>
    %c0_2 = arith.constant 0 : index
    %c0_3 = arith.constant 0 : index
    %1 = vector.load %arg1[%c0_2, %c0_3] : memref<16x32xf32, #tpu.memory_space<vmem>>, vector<16x32xf32>
    %c0_4 = arith.constant 0 : index
    %c0_5 = arith.constant 0 : index
    %2 = vector.load %arg3[%c0_4, %c0_5] : memref<32x32xf32, #tpu.memory_space<vmem>>, vector<32x32xf32>
    %cst = arith.constant dense<0.000000e+00> : vector<16x32xf32>
    %3 = tpu.matmul %1, %2, %cst {dimension_numbers = #tpu.dot_dimension_numbers<[1], [0], [0], [1], [0, 0, 1, 1], [], []>} : vector<16x32xf32>, vector<32x32xf32>, vector<16x32xf32> -> vector<16x32xf32>
    %c0_6 = arith.constant 0 : index
    %c0_7 = arith.constant 0 : index
    %4 = vector.load %arg4[%c0_6, %c0_7] : memref<1x32xf32, #tpu.memory_space<vmem>>, vector<1x32xf32>
    %5 = vector.broadcast %4 : vector<1x32xf32> to vector<16x32xf32>
    %6 = arith.addf %3, %5 : vector<16x32xf32>
    %7 = vector.shape_cast %6 : vector<16x32xf32> to vector<16x1x32xf32>
    %8 = vector.broadcast %7 : vector<16x1x32xf32> to vector<16x8x32xf32>
    %9 = arith.mulf %8, %0 : vector<16x8x32xf32>
    %cst_8 = arith.constant dense<0.000000e+00> : vector<16x8xf32>
    %10 = vector.multi_reduction <add>, %9, %cst_8 [2] : vector<16x8x32xf32> to vector<16x8xf32>
    %cst_9 = arith.constant dense<0xFF800000> : vector<16xf32>
    %11 = vector.multi_reduction <maximumf>, %10, %cst_9 [1] : vector<16x8xf32> to vector<16xf32>
    %12 = vector.shape_cast %11 : vector<16xf32> to vector<16x1xf32>
    %13 = vector.broadcast %12 : vector<16x1xf32> to vector<16x8xf32>
    %14 = arith.subf %10, %13 : vector<16x8xf32>
    %15 = math.exp %14 : vector<16x8xf32>
    %cst_10 = arith.constant dense<0.000000e+00> : vector<16xf32>
    %16 = vector.multi_reduction <add>, %15, %cst_10 [1] : vector<16x8xf32> to vector<16xf32>
    %17 = vector.shape_cast %16 : vector<16xf32> to vector<16x1xf32>
    %18 = vector.broadcast %17 : vector<16x1xf32> to vector<16x8xf32>
    %19 = arith.divf %15, %18 : vector<16x8xf32>
    %20 = vector.shape_cast %19 : vector<16x8xf32> to vector<16x8x1xf32>
    %21 = vector.broadcast %20 : vector<16x8x1xf32> to vector<16x8x32xf32>
    %22 = arith.mulf %21, %0 : vector<16x8x32xf32>
    %cst_11 = arith.constant dense<0.000000e+00> : vector<16x32xf32>
    %23 = vector.multi_reduction <add>, %22, %cst_11 [1] : vector<16x8x32xf32> to vector<16x32xf32>
    %c0_12 = arith.constant 0 : index
    %c0_13 = arith.constant 0 : index
    %24 = vector.load %arg5[%c0_12, %c0_13] : memref<16x32xf32, #tpu.memory_space<vmem>>, vector<16x32xf32>
    tpu.vector_store %arg5[%c0_12, %c0_13], %23 {strides = array<i32>} : memref<16x32xf32, #tpu.memory_space<vmem>>, vector<16x32xf32>,
    return
  }
  func.func @transform_0(%arg0: i32) -> (i32, i32) {
    %c0_i32 = arith.constant 0 : i32
    %c0_i32_0 = arith.constant 0 : i32
    return %arg0, %c0_i32 : i32, i32
  }
  func.func @transform_1(%arg0: i32) -> (i32, i32, i32) {
    %c0_i32 = arith.constant 0 : i32
    %c0_i32_0 = arith.constant 0 : i32
    %c0_i32_1 = arith.constant 0 : i32
    return %arg0, %c0_i32, %c0_i32_0 : i32, i32, i32
  }
  func.func @transform_2(%arg0: i32) -> (i32, i32) {
    %c0_i32 = arith.constant 0 : i32
    %c0_i32_0 = arith.constant 0 : i32
    %c0_i32_1 = arith.constant 0 : i32
    return %c0_i32, %c0_i32_0 : i32, i32
  }
  func.func @transform_3(%arg0: i32) -> (i32, i32) {
    %c0_i32 = arith.constant 0 : i32
    %c0_i32_0 = arith.constant 0 : i32
    %c0_i32_1 = arith.constant 0 : i32
    return %c0_i32, %c0_i32_0 : i32, i32
  }
  func.func @transform_4(%arg0: i32) -> (i32, i32) {
    %c0_i32 = arith.constant 0 : i32
    %c0_i32_0 = arith.constant 0 : i32
    return %arg0, %c0_i32 : i32, i32
  }
}

module attributes {stable_mosaic.version = 11 : i64} {
  func.func @_attention_kernel(%arg0: i32, %arg1: memref<16x32xf32, #tpu.memory_space<vmem>>, %arg2: memref<16x8x32xf32, #tpu.memory_space<vmem>>, %arg3: memref<32x32xf32, #tpu.memory_space<vmem>>, %arg4: memref<1x32xf32, #tpu.memory_space<vmem>>, %arg5: memref<16x32xf32, #tpu.memory_space<vmem>>) attributes {dimension_semantics = [#tpu.dimension_semantics<parallel>], iteration_bounds = array<i64: 2>, scalar_prefetch = 0 : i64, scratch_operands = 0 : i64, tpu.core_type = #tpu.core_type<tc>, window_params = [{transform_indices = @transform_0, window_bounds = array<i64: 16, 32>}, {transform_indices = @transform_1, window_bounds = array<i64: 16, 8, 32>}, {pipeline_mode = #tpu.pipeline_mode<synchronous>, transform_indices = @transform_2, window_bounds = array<i64: 32, 32>}, {pipeline_mode = #tpu.pipeline_mode<synchronous>, transform_indices = @transform_3, window_bounds = array<i64: 1, 32>}, {transform_indices = @transform_4, window_bounds = array<i64: 16, 32>}]} {
    %c0 = arith.constant 0 : index
    %c0_0 = arith.constant 0 : index
    %c0_1 = arith.constant 0 : index
    %0 = vector.load %arg2[%c0, %c0_0, %c0_1] : memref<16x8x32xf32, #tpu.memory_space<vmem>>, vector<16x8x32xf32>
    %c0_2 = arith.constant 0 : index
    %c0_3 = arith.constant 0 : index
    %1 = vector.load %arg1[%c0_2, %c0_3] : memref<16x32xf32, #tpu.memory_space<vmem>>, vector<16x32xf32>
    %c0_4 = arith.constant 0 : index
    %c0_5 = arith.constant 0 : index
    %2 = vector.load %arg3[%c0_4, %c0_5] : memref<32x32xf32, #tpu.memory_space<vmem>>, vector<32x32xf32>
    %cst = arith.constant dense<0.000000e+00> : vector<16x32xf32>
    %3 = tpu.matmul %1, %2, %cst {dimension_numbers = #tpu.dot_dimension_numbers<[1], [0], [0], [1], [0, 0, 1, 1], [], []>} : vector<16x32xf32>, vector<32x32xf32>, vector<16x32xf32> -> vector<16x32xf32>
    %c0_6 = arith.constant 0 : index
    %c0_7 = arith.constant 0 : index
    %4 = vector.load %arg4[%c0_6, %c0_7] : memref<1x32xf32, #tpu.memory_space<vmem>>, vector<1x32xf32>
    %5 = vector.broadcast %4 : vector<1x32xf32> to vector<16x32xf32>
    %6 = arith.addf %3, %5 : vector<16x32xf32>
    %7 = vector.shape_cast %6 : vector<16x32xf32> to vector<16x1x32xf32>
    %8 = vector.broadcast %7 : vector<16x1x32xf32> to vector<16x8x32xf32>
    %9 = arith.mulf %8, %0 : vector<16x8x32xf32>
    %cst_8 = arith.constant dense<0.000000e+00> : vector<16x8xf32>
    %10 = vector.multi_reduction <add>, %9, %cst_8 [2] : vector<16x8x32xf32> to vector<16x8xf32>
    %cst_9 = arith.constant dense<0xFF800000> : vector<16xf32>
    %11 = vector.multi_reduction <maximumf>, %10, %cst_9 [1] : vector<16x8xf32> to vector<16xf32>
    %12 = vector.shape_cast %11 : vector<16xf32> to vector<16x1xf32>
    %13 = vector.broadcast %12 : vector<16x1xf32> to vector<16x8xf32>
    %14 = arith.subf %10, %13 : vector<16x8xf32>
    %15 = math.exp %14 : vector<16x8xf32>
    %cst_10 = arith.constant dense<0.000000e+00> : vector<16xf32>
    %16 = vector.multi_reduction <add>, %15, %cst_10 [1] : vector<16x8xf32> to vector<16xf32>
    %17 = vector.shape_cast %16 : vector<16xf32> to vector<16x1xf32>
    %18 = vector.broadcast %17 : vector<16x1xf32> to vector<16x8xf32>
    %19 = arith.divf %15, %18 : vector<16x8xf32>
    %20 = vector.shape_cast %19 : vector<16x8xf32> to vector<16x8x1xf32>
    %21 = vector.broadcast %20 : vector<16x8x1xf32> to vector<16x8x32xf32>
    %22 = arith.mulf %21, %0 : vector<16x8x32xf32>
    %cst_11 = arith.constant dense<0.000000e+00> : vector<16x32xf32>
    %23 = vector.multi_reduction <add>, %22, %cst_11 [1] : vector<16x8x32xf32> to vector<16x32xf32>
    %c0_12 = arith.constant 0 : index
    %c0_13 = arith.constant 0 : index
    %24 = vector.load %arg5[%c0_12, %c0_13] : memref<16x32xf32, #tpu.memory_space<vmem>>, vector<16x32xf32>
    tpu.vector_store %arg5[%c0_12, %c0_13], %23 {strides = array<i32>} : memref<16x32xf32, #tpu.memory_space<vmem>>, vector<16x32xf32>,
    return
  }
  func.func @transform_0(%arg0: i32) -> (i32, i32) {
    %c0_i32 = arith.constant 0 : i32
    %c0_i32_0 = arith.constant 0 : i32
    return %arg0, %c0_i32 : i32, i32
  }
  func.func @transform_1(%arg0: i32) -> (i32, i32, i32) {
    %c0_i32 = arith.constant 0 : i32
    %c0_i32_0 = arith.constant 0 : i32
    %c0_i32_1 = arith.constant 0 : i32
    return %arg0, %c0_i32, %c0_i32_0 : i32, i32, i32
  }
  func.func @transform_2(%arg0: i32) -> (i32, i32) {
    %c0_i32 = arith.constant 0 : i32
    %c0_i32_0 = arith.constant 0 : i32
    %c0_i32_1 = arith.constant 0 : i32
    return %c0_i32, %c0_i32_0 : i32, i32
  }
  func.func @transform_3(%arg0: i32) -> (i32, i32) {
    %c0_i32 = arith.constant 0 : i32
    %c0_i32_0 = arith.constant 0 : i32
    %c0_i32_1 = arith.constant 0 : i32
    return %c0_i32, %c0_i32_0 : i32, i32
  }
  func.func @transform_4(%arg0: i32) -> (i32, i32) {
    %c0_i32 = arith.constant 0 : i32
    %c0_i32_0 = arith.constant 0 : i32
    return %arg0, %c0_i32 : i32, i32
  }
}

</mosaic_0001>

<bundles_post_ra>
// kernel: tpu_custom_call.1
= control target key start
LH: loop header
LB: loop body
LE: loop exit
PB: predicated region body
PF: predicated region fallthrough
CT: control target
= control target key end

     0   :  { %s2518_s0 = inlined_call_operand.hbm [shape: f32[32,32], index: 0, kind: input, shape index: {}]   ;;  %s2519_s1 = inlined_call_operand.hbm [shape: f32[32,8,32], index: 1, kind: input, shape index: {}]   ;;  %s2520_s2 = inlined_call_operand.hbm [shape: f32[32,32], index: 2, kind: input, shape index: {}]   ;;  %s2521_s3 = inlined_call_operand.vmem [shape: f32[1,32], index: 3, kind: input, shape index: {}]   ;;  %s2522_s4 = inlined_call_operand.hbm [shape: f32[32,32], index: 4, kind: output, shape index: {}]  }
   0x1   :  { %2532 = sst [smem:[#allocation15_spill]] %s2520_s2 }
   0x2   :  { %9 = vsyncpa [#allocation3], 0 }
   0x3   :  { %11 = vsyncpa [#allocation3 + $0x1], 0 }
   0x4   :  { %12 = vsyncpa [#allocation6], 0 }
   0x5   :  { %14 = vsyncpa [#allocation6 + $0x1], 0 }
   0x6   :  { %15 = vsyncpa [#allocation4], 0 }
   0x7   :  { %17 = vsyncpa [#allocation4 + $0x1], 0  ;;  %s1709_s15 = smov 0   ;;  %s1711_s16 = smov 0  }
   0x8   :  { %s1713_s17 = smov 0   ;;  %s1715_s18 = smov 0  }
   0x9 LB: > { %2533 = sst [smem:[#allocation13_spill]] %s1672_s17  ;;  %s1730_s19 = sadd.s32 4294967295, %s1676_s18   ;;  %s1676_s18 = sphi %s1715_s18, %s2586_s18   ;;  %s1672_s17 = sphi %s1713_s17, %s2583_s17   ;;  %s1668_s16 = sphi %s1711_s16, %s2585_s16   ;;  %s1664_s15 = sphi %s1709_s15, %s2584_s15  }
   0xa   : > { %s1332_s20 = sadd.s32 4294967294, %s1676_s18   ;;  %p43_p0 = scmp.ne.s32.totalorder %s1668_s16, %s1664_s15 }
   0xb   : > { %p44_p1 = scmp.eq.s32.totalorder %s1730_s19, 0  ;;  %p135_p2 = scmp.eq.s32.totalorder %s1730_s19, 1 }
   0xc   : > { %p141_p3 = scmp.eq.s32.totalorder %s1332_s20, 1  ;;  %p1333_p5 = scmp.ge.s32.totalorder %s1676_s18, 1 }
   0xd   : > { %p1739_p4 = por %p44_p1, %p43_p0  ;;  %p148_p7 = scmp.lt.s32.totalorder %s1676_s18, 3 }
   0xe   : > { %p1744_p6 = por %p141_p3, %p43_p0  ;;  %s2536_s2 = sld [smem:[#allocation15_spill]] }
   0xf   : > { %p1752_p8 = pnand %p1333_p5, %p148_p7  ;;  %s1678_s27 = smov [#allocation7]  }
  0x10   : > { %s161_s28 = sshll.u32 %s1678_s27, 4  ;;  %s1762_s29 = sadd.s32 1, %s1676_s18   ;;  %s162_s28 = int_to_ptr.vmem [resolvable:$true] %s161_s28 }
  0x11   : > { %p1371_p9 = pneg %p1752_p8  ;;  %s2523_s30 = smov 128  }
  0x12   : > { %s2525_s5 = smov 8   ;;  %s27_s6 = ssub.s32 %s1676_s18, %s1762_s29 }
  0x13   : > { %p1372_p10 = pnand %p1371_p9, %p44_p1  ;;  %s30_s7 = sadd.s32 1, %s1672_s17 }
  0x14   : > { %s159_s25 = sshll.u32 %s2536_s2, 4  ;;  %p28_p12 = scmp.eq.s32.totalorder %s27_s6, 0  ;;  %s160_s25 = int_to_ptr.hbm [resolvable:$true] %s159_s25 }
  0x15   : > { %1374 = dma.hbm_to_vmem [thread:$0]  (!%p1372_p10), %s160_s25, 512, %s162_s28, [#allocation6], %s2523_s30, %s2523_s30, %s2525_s5  }
  0x16   : > { %p37_p13 = scmp.ne.s32.totalorder %s1672_s17, %s1668_s16  ;;  %p38_p0 = scmp.eq.s32.totalorder %s1676_s18, 0 }
  0x17   : > { %p1387_p3 = scmp.lt.s32.totalorder %s1676_s18, 2  ;;  %s1784_s10 = sand.u32 1, %s1672_s17  }
  0x18   : > { %s1775_s8 = scalar_select %p28_p12, %s1672_s17, %s30_s7  }
  0x19   : > { %p39_p5 = por %p38_p0, %p37_p13  ;;  %p1779_p7 = por %p135_p2, %p37_p13 }
  0x1a   : > { %2538 = sst [smem:[#allocation14_spill]] %s1775_s8  ;;  %s1354_s11 = sshll.u32 %s1676_s18, 4 }
  0x1b   : > { %s1336_s12 = sshll.u32 %s1784_s10, 4  ;;  %s187_s20 = scalar_lea.hbm %s2518_s0, %s1354_s11 }
  0x1c   : > { %s188_s23 = sshll.u32 %s187_s20, 4  ;;  %s182_s24 = scalar_lea.vmem [#allocation2], %s1336_s12  ;;  %s189_s23 = int_to_ptr.hbm [resolvable:$true] %s188_s23 }
  0x1d   : > { %s190_s25 = sshll.u32 %s182_s24, 4  ;;  %p1793_p2 = pnand %p1387_p3, %p39_p5  ;;  %s191_s25 = int_to_ptr.vmem [resolvable:$true] %s190_s25 }
  0x1e   : > { %s200_s28 = sand.u32 1, %s1676_s18   ;;  %s1339_s6 = sshll.u32 %s1784_s10, 7 }
  0x1f   : > { %s179_s7 = scalar_lea.sflag [#allocation3], %s1784_s10  ;;  %s1542_s30 = sshra.s32 %s189_s23, 4  ;;  %s1543_s30 = int_to_ptr.hbm [resolvable:$true] %s1542_s30 }
  0x20   : > { %s1544_s5 = scalar_lea.hbm %s1543_s30, 16  ;;  %p1546_p10 = pneg %p1793_p2 }
  0x21   : > { %p1545_p9 = scmp.ne.s32.totalorder %s1543_s30, %s1544_s5  ;;  %s1549_s13 = scalar_lea.hbm %s2518_s0, 32 }
  0x22   : > { %p1550_p0 = scmp.lt.s32.totalorder %s1543_s30, %s2518_s0  ;;  %p1551_p3 = scmp.lt.s32.totalorder %s1549_s13, %s1544_s5 }
  0x23   : > { %p1547_p12 = pnand %p1546_p10, %p1545_p9 }
  0x24   : > { %p1552_p5 = por %p1551_p3, %p1550_p0 }
  0x25   : > { %p1548_p13 = pneg %p1547_p12 }
  0x27   : > { %p1553_p11 = pnand %p1552_p5, %p1548_p13 }
  0x29   : > { %1556 = shalt.err (!%p1553_p11)
}
  0x2a   : > { %s2541_s10 = smov 8   ;;  %s2542_s24 = smov 128  }
  0x2b   : > { %1378 = dma.hbm_to_vmem [thread:$0]  (!%p1793_p2), %s189_s23, 256, %s191_s25, %s179_s7, %s2542_s24, %s2542_s24, %s2541_s10  }
  0x2c   : > { %s1355_s2 = sshll.u32 %s1676_s18, 7  ;;  %s204_s8 = scalar_lea.vmem [#allocation5], %s1339_s6 }
  0x2d   : > { %s212_s11 = sshll.u32 %s204_s8, 4  ;;  %s209_s14 = scalar_lea.hbm %s2519_s1, %s1355_s2  ;;  %s213_s11 = int_to_ptr.vmem [resolvable:$true] %s212_s11 }
  0x2e   : > { %s210_s30 = sshll.u32 %s209_s14, 4  ;;  %s201_s5 = scalar_lea.sflag [#allocation6], %s200_s28  ;;  %s211_s30 = int_to_ptr.hbm [resolvable:$true] %s210_s30 }
  0x2f   : > { %s1572_s13 = sshra.s32 %s211_s30, 4  ;;  %s1579_s8 = scalar_lea.hbm %s2519_s1, 256  ;;  %s1573_s13 = int_to_ptr.hbm [resolvable:$true] %s1572_s13 }
  0x30   : > { %s1574_s20 = scalar_lea.hbm %s1573_s13, 128  ;;  %p1580_p13 = scmp.lt.s32.totalorder %s1573_s13, %s2519_s1 }
  0x31   : > { %p1575_p11 = scmp.ne.s32.totalorder %s1573_s13, %s1574_s20  ;;  %p1581_p0 = scmp.lt.s32.totalorder %s1579_s8, %s1574_s20 }
  0x33   : > { %p1577_p9 = pnand %p1575_p11, %p1546_p10  ;;  %p1582_p3 = por %p1581_p0, %p1580_p13 }
  0x35   : > { %p1578_p12 = pneg %p1577_p9 }
  0x37   : > { %p1583_p5 = pnand %p1582_p3, %p1578_p12 }
  0x39   : > { %1586 = shalt.err (!%p1583_p5)
}
  0x3a   : > { %1381 = dma.hbm_to_vmem [thread:$0]  (!%p1793_p2), %s211_s30, 2048, %s213_s11, %s201_s5, %s2542_s24, %s2542_s24, %s2541_s10  }
  0x3b   : > { %224 = sbr.rel (%p1752_p8) target bundleno = 974 (0x3ce), region = 36  ;;  %s1837_s2 = sand.u32 (!%p1752_p8), 1, %s1668_s16  }
  0x3c   : > { %s1343_s17 = sshll.u32 (!%p1752_p8), %s1837_s2, 4  ;;  %s227_s28 = scalar_lea.sflag (!%p1752_p8), [#allocation3], %s1837_s2 }
  0x3d   : > { %s230_s12 = scalar_lea.vmem (!%p1752_p8), [#allocation2], %s1343_s17 }
  0x40   : > { %1647 = dma.done.wait (%p1739_p4), %s227_s28, 256  }
  0x41   : > { %1649 = vsyncadd (%p1739_p4), %s227_s28, 4294967040  ;;  %s236_s26 = sand.u32 1, %s1730_s19   ;;  %s1344_s27 = sshll.u32 %s1837_s2, 7 }
  0x42   : > { %s237_s10 = scalar_lea.sflag [#allocation6], %s236_s26  ;;  %s1849_s24 = scalar_lea.vmem [#allocation5], %s1344_s27 }
  0x43   : > { %1651 = dma.done.wait (%p1739_p4), %s237_s10, 2048  }
  0x44   : > { %1653 = vsyncadd (%p1739_p4), %s237_s10, 4294965248 }
  0x45   : > { %1655 = dma.done.wait (%p44_p1), [#allocation6], 512  }
  0x46   : > { %1657 = vsyncadd (%p44_p1), [#allocation6], 4294966784  ;;  %v300_v0 = vld [vmem:[#allocation7 + $0x18] sm:$0xff]  ;;  %v299_v1 = vld [vmem:[#allocation7 + $0x10] sm:$0xff]  ;;  %vm305_vm0 = vcmask 261120   ;;  %vm481_vm1 = vcmask 1041409  }
  0x47   : > { %324 = vmatpush.msra.mxu0 %v300_v0  ;;  %1357 = vmatpush.msra.mxu1 %v300_v0  ;;  %v298_v2 = vld [vmem:[#allocation7 + $0x8] sm:$0xff]  ;;  %v297_v3 = vld [vmem:[#allocation7] sm:$0xff]  ;;  %v281_v17 = vld [vmem:[%s1849_s24 + $0x10] sm:$0xff]  ;;  %vm483_vm2 = vcmask 1042434   ;;  %vm485_vm3 = vcmask 1043459   ;;  %vm2531_vm4 = vcmask 1044484  }
  0x48   : > { %v295_v4 = vld [vmem:[%s230_s12] sm:$0xff]  ;;  %v296_v5 = vld [vmem:[%s230_s12 + $0x8] sm:$0xff]  ;;  %vm2530_vm5 = vcmask 1045509   ;;  %vm2529_vm6 = vcmask 1046534   ;;  %vm2528_vm7 = vcmask 1047559   ;;  %vm504_vm8 = vcmask 64512  }
  0x49   : > { %325 = vmatpush.msra.mxu0 %v299_v1  ;;  %1358 = vmatpush.msra.mxu1 %v299_v1  ;;  %v1431_v6 = vld [vmem:[%s2521_s3] ss:$0 sm:$0xff]  ;;  %v288_v24 = vld [vmem:[%s1849_s24 + $0x48] sm:$0xff]  ;;  %v289_v31 = vld [vmem:[%s1849_s24 + $0x50] sm:$0xff]  ;;  %s1356_s14 = sshll.u32 %s1730_s19, 4  ;;  %s275_s19 = scalar_lea.vmem [#allocation8], %s1343_s17 }
  0x4a   : > { %v287_v11 = vld [vmem:[%s1849_s24 + $0x40] sm:$0xff]  ;;  %v280_v30 = vld [vmem:[%s1849_s24 + $0x8] sm:$0xff]  ;;  %v290_v44 = vld [vmem:[%s1849_s24 + $0x58] sm:$0xff]  ;;  %s1223_s13 = scalar_lea.hbm %s2522_s4, %s1356_s14  ;;  %s1224_s20 = sshll.u32 %s275_s19, 4  ;;  %s1225_s20 = int_to_ptr.vmem [resolvable:$true] %s1224_s20 }
  0x4b   : > { %326 = vmatpush.msra.mxu0 %v298_v2  ;;  %1359 = vmatpush.msra.mxu1 %v298_v2  ;;  %v279_v12 = vld [vmem:[%s1849_s24] sm:$0xff]  ;;  %v282_v45 = vld [vmem:[%s1849_s24 + $0x18] sm:$0xff]  ;;  %v284_v58 = vld [vmem:[%s1849_s24 + $0x28] sm:$0xff]  ;;  %s1226_s23 = sshll.u32 %s1223_s13, 4  ;;  %s1212_s25 = scalar_lea.sflag [#allocation4], %s1837_s2  ;;  %s1227_s23 = int_to_ptr.hbm [resolvable:$true] %s1226_s23 }
  0x4c   : > { %v283_v47 = vld [vmem:[%s1849_s24 + $0x20] sm:$0xff]  ;;  %v292_v62 = vld [vmem:[%s1849_s24 + $0x68] sm:$0xff]  ;;  %s1616_s8 = sshra.s32 %s1227_s23, 4  ;;  %s1622_s28 = scalar_lea.hbm %s2522_s4, 32  ;;  %s1617_s8 = int_to_ptr.hbm [resolvable:$true] %s1616_s8 }
  0x4d   : > { %327 = vmatpush.msra.mxu0 %v297_v3  ;;  %1360 = vmatpush.msra.mxu1 %v297_v3  ;;  %v291_v59 = vld [vmem:[%s1849_s24 + $0x60] sm:$0xff]  ;;  %s1618_s6 = scalar_lea.hbm %s1617_s8, 16  ;;  %p1623_p2 = scmp.lt.s32.totalorder %s1617_s8, %s2522_s4 }
  0x4e   : > { %1347 = vmatmul.msk.f32.vlgmr.msra.gmra.mxu0 %vm305_vm0, %v295_v4  ;;  %1348 = vmatmul.msk.f32.vlgmr.msra.gmra.mxu1 %vm305_vm0, %v296_v5  ;;  %p1619_p1 = scmp.ne.s32.totalorder %s1617_s8, %s1618_s6  ;;  %p1624_p10 = scmp.lt.s32.totalorder %s1622_s28, %s1618_s6 }
  0x50   : > { %p1620_p4 = pnand %p1619_p1, %p1779_p7  ;;  %p1625_p11 = por %p1624_p10, %p1623_p2 }
  0x52   : > { %p1621_p8 = pneg %p1620_p4 }
  0x54   : > { %p1626_p9 = pnand %p1625_p11, %p1621_p8 }
  0xcb   : > { %v329_v7 = vpop.f32.mrf.mxu0  ;;  %v332_v8 = vpop.f32.mrf.mxu1 }
  0xcc   : > { %v1864_v9 = vadd.f32 %v1431_v6, %v329_v7  ;;  %v1866_v10 = vadd.f32 %v1431_v6, %v332_v8 }
  0xce   : > { %v359_v13 = vperm.slane %v1866_v10, 0  ;;  %v351_v14 = vperm.slane %v1864_v9, 0  ;;  %v338_v15 = vrot.slane %v1864_v9, 2  ;;  %v344_v16 = vrot.slane %v1866_v10, 1 }
  0xcf   : > { %v337_v18 = vrot.slane %v1864_v9, 1  ;;  %v345_v19 = vrot.slane %v1866_v10, 2  ;;  %v346_v36 = vrot.slane %v1866_v10, 3  ;;  %v339_v37 = vrot.slane %v1864_v9, 3 }
  0xd0   : > { %v391_v20 = vmul.f32 %v359_v13, %v287_v11  ;;  %v383_v21 = vmul.f32 %v351_v14, %v279_v12  ;;  %v353_v22 = vperm.slane %v338_v15, 0  ;;  %v360_v23 = vperm.slane %v344_v16, 0  ;;  %v293_v11 = vld [vmem:[%s1849_s24 + $0x70] sm:$0xff]  ;;  %v286_v15 = vld [vmem:[%s1849_s24 + $0x38] sm:$0xff] }
  0xd1   : > { %v352_v25 = vperm.slane %v337_v18, 0  ;;  %v361_v29 = vperm.slane %v345_v19, 0  ;;  %v340_v39 = vrot.slane %v1864_v9, 4  ;;  %v362_v42 = vperm.slane %v346_v36, 0  ;;  %v285_v12 = vld [vmem:[%s1849_s24 + $0x30] sm:$0xff] }
  0xd2   : > { %v423_v26 = vsel %vm305_vm0, %v391_v20, 0.0  ;;  %v399_v27 = vsel %vm305_vm0, %v383_v21, 0.0  ;;  %v385_v28 = vmul.f32 %v353_v22, %v281_v17  ;;  %v392_v33 = vmul.f32 %v360_v23, %v288_v24  ;;  %v294_v22 = vld [vmem:[%s1849_s24 + $0x78] sm:$0xff] }
  0xd3   : > { %424 = vadd.xlane.f32.xlu1 %v423_v26  ;;  %400 = vadd.xlane.f32.xlu0 %v399_v27  ;;  %v384_v34 = vmul.f32 %v352_v25, %v280_v30  ;;  %v393_v35 = vmul.f32 %v361_v29, %v289_v31  ;;  %v354_v43 = vperm.slane %v339_v37, 0  ;;  %v355_v46 = vperm.slane %v340_v39, 0 }
  0xd4   : > { %v405_v32 = vsel %vm305_vm0, %v385_v28, 0.0  ;;  %v426_v38 = vsel %vm305_vm0, %v392_v33, 0.0  ;;  %v394_v48 = vmul.f32 %v362_v42, %v290_v44  ;;  %v341_v50 = vrot.slane %v1864_v9, 5 }
  0xd5   : > { %406 = vadd.xlane.f32.xlu2 %v405_v32  ;;  %v402_v40 = vsel %vm305_vm0, %v384_v34, 0.0  ;;  %v429_v41 = vsel %vm305_vm0, %v393_v35, 0.0  ;;  %v386_v49 = vmul.f32 %v354_v43, %v282_v45  ;;  %v347_v51 = vrot.slane %v1866_v10, 4 }
  0xd6   : > { %v387_v52 = vmul.f32 %v355_v46, %v283_v47  ;;  %v348_v53 = vrot.slane %v1866_v10, 5  ;;  %v432_v54 = vsel %vm305_vm0, %v394_v48, 0.0  ;;  %v356_v56 = vperm.slane %v341_v50, 0 }
  0xd7   : > { %v408_v55 = vsel %vm305_vm0, %v386_v49, 0.0  ;;  %v363_v57 = vperm.slane %v347_v51, 0  ;;  %v349_v1 = vrot.slane %v1866_v10, 6  ;;  %v342_v2 = vrot.slane %v1864_v9, 6 }
  0xd8   : > { %v411_v60 = vsel %vm305_vm0, %v387_v52, 0.0  ;;  %v364_v61 = vperm.slane %v348_v53, 0  ;;  %v388_v63 = vmul.f32 %v356_v56, %v284_v58  ;;  %v343_v4 = vrot.slane %v1864_v9, 7 }
  0xd9   : > { %v395_v0 = vmul.f32 %v363_v57, %v291_v59  ;;  %v365_v7 = vperm.slane %v349_v1, 0  ;;  %v357_v8 = vperm.slane %v342_v2, 0  ;;  %v350_v9 = vrot.slane %v1866_v10, 7 }
  0xda   : > { %v396_v3 = vmul.f32 %v364_v61, %v292_v62  ;;  %v414_v5 = vsel %vm305_vm0, %v388_v63, 0.0  ;;  %v358_v14 = vperm.slane %v343_v4, 0  ;;  %v463_v31 = vlaneseq }
  0xdb   : > { %427 = vadd.xlane.f32.xlu1 %v426_v38  ;;  %403 = vadd.xlane.f32.xlu0 %v402_v40  ;;  %v435_v6 = vsel %vm305_vm0, %v395_v0, 0.0  ;;  %v397_v16 = vmul.f32 %v365_v7, %v293_v11  ;;  %v389_v17 = vmul.f32 %v357_v8, %v285_v12  ;;  %v366_v21 = vperm.slane %v350_v9, 0 }
  0xdc   : > { %v438_v13 = vsel %vm305_vm0, %v396_v3, 0.0  ;;  %v390_v18 = vmul.f32 %v358_v14, %v286_v15  ;;  %v1934_v35 = vand.u32 127, %v463_v31 }
  0xdd   : > { %430 = vadd.xlane.f32.xlu2 %v429_v41  ;;  %v441_v19 = vsel %vm305_vm0, %v397_v16, 0.0  ;;  %v417_v20 = vsel %vm305_vm0, %v389_v17, 0.0  ;;  %v398_v24 = vmul.f32 %v366_v21, %v294_v22 }
  0xde   : > { %v420_v23 = vsel %vm305_vm0, %v390_v18, 0.0 }
  0xdf   : > { %v444_v25 = vsel %vm305_vm0, %v398_v24, 0.0 }
  0xe3   : > { %433 = vadd.xlane.f32.xlu1 %v432_v54  ;;  %409 = vadd.xlane.f32.xlu0 %v408_v55 }
  0xe5   : > { %412 = vadd.xlane.f32.xlu2 %v411_v60 }
  0xeb   : > { %415 = vadd.xlane.f32.xlu1 %v414_v5  ;;  %436 = vadd.xlane.f32.xlu0 %v435_v6 }
  0xed   : > { %439 = vadd.xlane.f32.xlu2 %v438_v13  ;;  %v1681_v13 = vmov 0  }
  0xee   : > { %1430 = vset.pattern.permute.xlu2 %v1681_v13  ;;  %1429 = vset.pattern.permute.xlu1 %v1681_v13 }
  0xef   : > { %1428 = vset.pattern.permute.xlu0 %v1681_v13 }
  0xf3   : > { %442 = vadd.xlane.f32.xlu1 %v441_v19  ;;  %418 = vadd.xlane.f32.xlu0 %v417_v20 }
  0xf5   : > { %421 = vadd.xlane.f32.xlu2 %v420_v23 }
  0xfb   : > { %445 = vadd.xlane.f32.xlu0 %v444_v25 }
 0x146   : > { %v1916_v26 = vpop.xlane.xlu1 %424  ;;  %v1918_v27 = vpop.xlane.xlu0 %400 }
 0x147   : > { %v465_v37 = vperm.slane %v1918_v27, %v1934_v35  ;;  %v473_v44 = vperm.slane %v1916_v26, %v1934_v35 }
 0x148   : > { %v1920_v10 = vpop.xlane.xlu2 %406 }
 0x149   : > { %v467_v43 = vperm.slane %v1920_v10, %v1934_v35 }
 0x14e   : > { %v1922_v28 = vpop.xlane.xlu1 %427  ;;  %v1924_v29 = vpop.xlane.xlu0 %403 }
 0x14f   : > { %v466_v36 = vperm.slane %v1924_v29, %v1934_v35  ;;  %v474_v45 = vperm.slane %v1922_v28, %v1934_v35 }
 0x150   : > { %v1926_v30 = vpop.xlane.xlu2 %430 }
 0x151   : > { %v482_v40 = vsel %vm481_vm1, %v466_v36, %v465_v37  ;;  %v475_v50 = vperm.slane %v1926_v30, %v1934_v35  ;;  %v495_v52 = vsel %vm481_vm1, %v474_v45, %v473_v44 }
 0x152   : > { %v484_v46 = vsel %vm483_vm2, %v467_v43, %v482_v40 }
 0x153   : > { %v496_v62 = vsel %vm483_vm2, %v475_v50, %v495_v52 }
 0x156   : > { %v1928_v32 = vpop.xlane.xlu1 %433  ;;  %v1930_v33 = vpop.xlane.xlu0 %409 }
 0x157   : > { %v468_v41 = vperm.slane %v1930_v33, %v1934_v35  ;;  %v476_v53 = vperm.slane %v1928_v32, %v1934_v35 }
 0x158   : > { %v1932_v34 = vpop.xlane.xlu2 %412 }
 0x159   : > { %v469_v47 = vperm.slane %v1932_v34, %v1934_v35  ;;  %v486_v48 = vsel %vm485_vm3, %v468_v41, %v484_v46  ;;  %v497_v63 = vsel %vm485_vm3, %v476_v53, %v496_v62 }
 0x15b   : > { %v488_v54 = vsel %vm2531_vm4, %v469_v47, %v486_v48 }
 0x15e   : > { %v1940_v38 = vpop.xlane.xlu0 %436  ;;  %v1942_v39 = vpop.xlane.xlu1 %415 }
 0x15f   : > { %v470_v49 = vperm.slane %v1942_v39, %v1934_v35  ;;  %v477_v56 = vperm.slane %v1940_v38, %v1934_v35 }
 0x160   : > { %v1947_v42 = vpop.xlane.xlu2 %439 }
 0x161   : > { %v490_v58 = vsel %vm2530_vm5, %v470_v49, %v488_v54  ;;  %v478_v0 = vperm.slane %v1947_v42, %v1934_v35  ;;  %v498_v2 = vsel %vm2531_vm4, %v477_v56, %v497_v63 }
 0x163   : > { %v499_v7 = vsel %vm2530_vm5, %v478_v0, %v498_v2 }
 0x166   : > { %v1963_v51 = vpop.xlane.xlu0 %418  ;;  %v1974_v59 = vpop.xlane.xlu1 %442 }
 0x167   : > { %v471_v55 = vperm.slane %v1963_v51, %v1934_v35  ;;  %v479_v3 = vperm.slane %v1974_v59, %v1934_v35 }
 0x168   : > { %v422_v57 = vpop.xlane.xlu2 %421 }
 0x169   : > { %v472_v60 = vperm.slane %v422_v57, %v1934_v35  ;;  %v492_v61 = vsel %vm2529_vm6, %v471_v55, %v490_v58  ;;  %v500_v8 = vsel %vm2529_vm6, %v479_v3, %v499_v7 }
 0x16b   : > { %v494_v1 = vsel %vm2528_vm7, %v472_v60, %v492_v61 }
 0x16c   : > { %v505_v4 = vsel %vm504_vm8, %v494_v1, -inf }
 0x16d   : > { %506 = vmax.xlane.f32.xlu1 %v505_v4 }
 0x16e   : > { %v1987_v5 = vpop.xlane.xlu0 %445 }
 0x16f   : > { %v480_v6 = vperm.slane %v1987_v5, %v1934_v35 }
 0x171   : > { %v501_v11 = vsel %vm2528_vm7, %v480_v6, %v500_v8 }
 0x172   : > { %v508_v12 = vsel %vm504_vm8, %v501_v11, -inf }
 0x173   : > { %509 = vmax.xlane.f32.xlu2 %v508_v12 }
 0x1e0   : > { %v507_v14 = vpop.xlane.xlu1 %506 }
 0x1e1   : > { %v514_v15 = vperm.slane %v507_v14, 1  ;;  %v513_v16 = vperm.slane %v507_v14, 0  ;;  %v515_v17 = vperm.slane %v507_v14, 2  ;;  %v517_v20 = vperm.slane %v507_v14, 4 }
 0x1e2   : > { %v520_v21 = vperm.slane %v507_v14, 7  ;;  %v516_v22 = vperm.slane %v507_v14, 3  ;;  %v518_v45 = vperm.slane %v507_v14, 5 }
 0x1e3   : > { %v546_v9 = vsub.f32 %v1924_v29, %v514_v15  ;;  %v545_v18 = vsub.f32 %v1918_v27, %v513_v16  ;;  %v547_v19 = vsub.f32 %v1920_v10, %v515_v17  ;;  %v549_v31 = vsub.f32 %v1932_v34, %v517_v20 }
 0x1e4   : > { %v552_v36 = vsub.f32 %v422_v57, %v520_v21  ;;  %v548_v29 = vsub.f32 %v1930_v33, %v516_v22  ;;  %v519_v27 = vperm.slane %v507_v14, 6  ;;  %v550_v48 = vsub.f32 %v1942_v39, %v518_v45 }
 0x1e5   : > { %v563_v23 = vmul.f32 1.442695, %v546_v9  ;;  %v561_v24 = vmul.f32 1.442695, %v545_v18  ;;  %v565_v25 = vmul.f32 1.442695, %v547_v19 }
 0x1e6   : > { %v1999_v37 = vpop.xlane.xlu2 %509  ;;  %v569_v40 = vmul.f32 1.442695, %v549_v31  ;;  %v575_v41 = vmul.f32 1.442695, %v552_v36  ;;  %v567_v44 = vmul.f32 1.442695, %v548_v29  ;;  %v551_v33 = vsub.f32 %v1963_v51, %v519_v27 }
 0x1e7   : > { %1432 = vpow2.f32 %v563_v23  ;;  %v523_v10 = vperm.slane %v1999_v37, 2  ;;  %v522_v50 = vperm.slane %v1999_v37, 1  ;;  %v526_v53 = vperm.slane %v1999_v37, 5 }
 0x1e8   : > { %1434 = vpow2.f32 %v561_v24  ;;  %v573_v49 = vmul.f32 1.442695, %v551_v33  ;;  %v571_v55 = vmul.f32 1.442695, %v550_v48  ;;  %v521_v56 = vperm.slane %v1999_v37, 0 }
 0x1e9   : > { %1436 = vpow2.f32 %v565_v25  ;;  %v555_v47 = vsub.f32 %v1926_v30, %v523_v10  ;;  %v554_v30 = vsub.f32 %v1922_v28, %v522_v50  ;;  %v558_v39 = vsub.f32 %v1947_v42, %v526_v53 }
 0x1ea   : > { %1438 = vpow2.f32 %v569_v40  ;;  %v553_v58 = vsub.f32 %v1916_v26, %v521_v56  ;;  %v525_v61 = vperm.slane %v1999_v37, 4  ;;  %v524_v1 = vperm.slane %v1999_v37, 3 }
 0x1eb   : > { %1440 = vpow2.f32 %v575_v41  ;;  %v581_v52 = vmul.f32 1.442695, %v555_v47  ;;  %v579_v60 = vmul.f32 1.442695, %v554_v30  ;;  %v587_v62 = vmul.f32 1.442695, %v558_v39 }
 0x1ec   : > { %1442 = vpow2.f32 %v567_v44  ;;  %v577_v0 = vmul.f32 1.442695, %v553_v58  ;;  %v557_v26 = vsub.f32 %v1940_v38, %v525_v61  ;;  %v556_v42 = vsub.f32 %v1928_v32, %v524_v1 }
 0x1ed   : > { %v2003_v43 = vpop.eup %1432  ;;  %1444 = vpow2.f32 %v573_v49  ;;  %v528_v4 = vperm.slane %v1999_v37, 7  ;;  %v527_v8 = vperm.slane %v1999_v37, 6 }
 0x1ee   : > { %v2005_v46 = vpop.eup %1434  ;;  %613 = vperm.xlu1 %1429, %v2003_v43   ;;  %1446 = vpow2.f32 %v581_v52  ;;  %v585_v3 = vmul.f32 1.442695, %v557_v26  ;;  %v583_v7 = vmul.f32 1.442695, %v556_v42 }
 0x1ef   : > { %v2008_v34 = vpop.eup %1436  ;;  %610 = vperm.xlu0 %1428, %v2005_v46   ;;  %1448 = vpow2.f32 %v571_v55  ;;  %v560_v38 = vsub.f32 %v1987_v5, %v528_v4  ;;  %v559_v32 = vsub.f32 %v1974_v59, %v527_v8 }
 0x1f0   : > { %616 = vperm.xlu2 %1430, %v2008_v34   ;;  %v2017_v54 = vpop.eup %1438  ;;  %1450 = vpow2.f32 %v579_v60 }
 0x1f1   : > { %v2020_v51 = vpop.eup %1440  ;;  %1452 = vpow2.f32 %v587_v62  ;;  %v591_v13 = vmul.f32 1.442695, %v560_v38  ;;  %v589_v15 = vmul.f32 1.442695, %v559_v32 }
 0x1f2   : > { %v2023_v57 = vpop.eup %1442  ;;  %1454 = vpow2.f32 %v577_v0 }
 0x1f3   : > { %v2031_v63 = vpop.eup %1444  ;;  %1456 = vpow2.f32 %v585_v3 }
 0x1f4   : > { %v2034_v2 = vpop.eup %1446  ;;  %1458 = vpow2.f32 %v583_v7 }
 0x1f5   : > { %v2037_v28 = vpop.eup %1448  ;;  %1460 = vpow2.f32 %v591_v13 }
 0x1f6   : > { %622 = vperm.xlu1 %1429, %v2017_v54   ;;  %v2044_v6 = vpop.eup %1450  ;;  %1462 = vpow2.f32 %v589_v15 }
 0x1f7   : > { %631 = vperm.xlu0 %1428, %v2020_v51   ;;  %v2047_v11 = vpop.eup %1452 }
 0x1f8   : > { %619 = vperm.xlu2 %1430, %v2023_v57   ;;  %v2050_v12 = vpop.eup %1454 }
 0x1f9   : > { %v2056_v14 = vpop.eup %1456 }
 0x1fa   : > { %v2059_v16 = vpop.eup %1458 }
 0x1fb   : > { %v2062_v17 = vpop.eup %1460 }
 0x1fc   : > { %v2065_v5 = vpop.eup %1462 }
 0x1fe   : > { %628 = vperm.xlu1 %1429, %v2031_v63  }
 0x1ff   : > { %640 = vperm.xlu0 %1428, %v2034_v2  }
 0x200   : > { %625 = vperm.xlu2 %1430, %v2037_v28  }
 0x206   : > { %637 = vperm.xlu1 %1429, %v2044_v6  }
 0x207   : > { %649 = vperm.xlu0 %1428, %v2047_v11  }
 0x208   : > { %634 = vperm.xlu2 %1430, %v2050_v12  }
 0x20e   : > { %646 = vperm.xlu1 %1429, %v2056_v14  }
 0x210   : > { %643 = vperm.xlu2 %1430, %v2059_v16  }
 0x216   : > { %655 = vperm.xlu1 %1429, %v2062_v17  }
 0x218   : > { %652 = vperm.xlu2 %1430, %v2065_v5  }
 0x24a   : > { %v617_v59 = vpop.permute.xlu2 %616 }
 0x24b   : > { %v659_v25 = vperm.slane %v617_v59, %v1934_v35 }
 0x252   : > { %v620_v9 = vpop.permute.xlu2 %619 }
 0x253   : > { %v660_v37 = vperm.slane %v620_v9, %v1934_v35 }
 0x25a   : > { %v626_v22 = vpop.permute.xlu2 %625 }
 0x25b   : > { %v662_v41 = vperm.slane %v626_v22, %v1934_v35 }
 0x260   : > { %v614_v18 = vpop.permute.xlu1 %613 }
 0x261   : > { %v611_v19 = vpop.permute.xlu0 %610  ;;  %v658_v20 = vperm.slane %v614_v18, %v1934_v35 }
 0x262   : > { %v657_v21 = vperm.slane %v611_v19, %v1934_v35  ;;  %v635_v44 = vpop.permute.xlu2 %634 }
 0x263   : > { %v665_v56 = vperm.slane %v635_v44, %v1934_v35 }
 0x264   : > { %v673_v23 = vsel %vm481_vm1, %v658_v20, %v657_v21 }
 0x265   : > { %v674_v31 = vsel %vm483_vm2, %v659_v25, %v673_v23 }
 0x266   : > { %v675_v29 = vsel %vm485_vm3, %v660_v37, %v674_v31 }
 0x268   : > { %v623_v24 = vpop.permute.xlu1 %622 }
 0x269   : > { %v661_v36 = vperm.slane %v623_v24, %v1934_v35  ;;  %v632_v40 = vpop.permute.xlu0 %631 }
 0x26a   : > { %v664_v33 = vperm.slane %v632_v40, %v1934_v35  ;;  %v644_v30 = vpop.permute.xlu2 %643 }
 0x26b   : > { %v676_v27 = vsel %vm2531_vm4, %v661_v36, %v675_v29  ;;  %v668_v62 = vperm.slane %v644_v30, %v1934_v35 }
 0x26c   : > { %v677_v47 = vsel %vm2530_vm5, %v662_v41, %v676_v27 }
 0x270   : > { %v629_v10 = vpop.permute.xlu1 %628 }
 0x271   : > { %v663_v45 = vperm.slane %v629_v10, %v1934_v35  ;;  %v641_v52 = vpop.permute.xlu0 %640 }
 0x272   : > { %v667_v58 = vperm.slane %v641_v52, %v1934_v35  ;;  %v653_v3 = vpop.permute.xlu2 %652 }
 0x273   : > { %v678_v48 = vsel %vm2529_vm6, %v663_v45, %v677_v47  ;;  %v671_v8 = vperm.slane %v653_v3, %v1934_v35 }
 0x274   : > { %v679_v49 = vsel %vm2528_vm7, %v664_v33, %v678_v48 }
 0x275   : > { %v689_v50 = vsel %vm504_vm8, %v679_v49, 0.0 }
 0x276   : > { %690 = vadd.xlane.f32.xlu0 %v689_v50 }
 0x278   : > { %v638_v53 = vpop.permute.xlu1 %637 }
 0x279   : > { %v666_v55 = vperm.slane %v638_v53, %v1934_v35  ;;  %v650_v1 = vpop.permute.xlu0 %649 }
 0x27a   : > { %v670_v4 = vperm.slane %v650_v1, %v1934_v35 }
 0x27b   : > { %v680_v39 = vsel %vm481_vm1, %v666_v55, %v665_v56 }
 0x27c   : > { %v681_v60 = vsel %vm483_vm2, %v667_v58, %v680_v39 }
 0x27d   : > { %v682_v26 = vsel %vm485_vm3, %v668_v62, %v681_v60 }
 0x280   : > { %v647_v61 = vpop.permute.xlu1 %646 }
 0x281   : > { %v669_v0 = vperm.slane %v647_v61, %v1934_v35 }
 0x283   : > { %v683_v42 = vsel %vm2531_vm4, %v669_v0, %v682_v26 }
 0x284   : > { %v684_v7 = vsel %vm2530_vm5, %v670_v4, %v683_v42 }
 0x285   : > { %v685_v13 = vsel %vm2529_vm6, %v671_v8, %v684_v7 }
 0x288   : > { %v656_v38 = vpop.permute.xlu1 %655 }
 0x289   : > { %v672_v32 = vperm.slane %v656_v38, %v1934_v35 }
 0x28b   : > { %v686_v15 = vsel %vm2528_vm7, %v672_v32, %v685_v13 }
 0x28c   : > { %v692_v59 = vsel %vm504_vm8, %v686_v15, 0.0 }
 0x28d   : > { %693 = vadd.xlane.f32.xlu2 %v692_v59 }
 0x2e9   : > { %v2100_v9 = vpop.xlane.xlu0 %690 }
 0x2ea   : > { %v697_v18 = vperm.slane %v2100_v9, 0  ;;  %v698_v19 = vperm.slane %v2100_v9, 1  ;;  %v2105_v20 = vperm.slane %v2100_v9, 2  ;;  %v2108_v21 = vperm.slane %v2100_v9, 3 }
 0x2eb   : > { %v2112_v35 = vperm.slane %v2100_v9, 4  ;;  %v2116_v22 = vperm.slane %v2100_v9, 6  ;;  %v2134_v60 = vperm.slane %v2100_v9, 5 }
 0x2ec   : > { %1464 = vrcp.f32 %v697_v18  ;;  %v738_v27 = vand.u32 2147483647, %v697_v18  ;;  %v740_v41 = vand.u32 2147483648, %v697_v18  ;;  %vm734_vm10 = vweird.f32 %v697_v18 }
 0x2ed   : > { %1466 = vrcp.f32 %v698_v19  ;;  %v753_v55 = vand.u32 2147483647, %v698_v19  ;;  %v755_v56 = vand.u32 2147483648, %v698_v19  ;;  %vm749_vm14 = vweird.f32 %v698_v19 }
 0x2ee   : > { %1468 = vrcp.f32 %v2105_v20  ;;  %vm739_vm12 = vcmp.eq.f32.partialorder %v738_v27, 8.507059e+37  ;;  %v741_v53 = vor.u32 1.1754944e-38, %v740_v41  ;;  %vm764_vm15 = vweird.f32 %v2105_v20 }
 0x2ef   : > { %1470 = vrcp.f32 %v2108_v21  ;;  %v756_v4 = vor.u32 1.1754944e-38, %v755_v56  ;;  %v768_v7 = vand.u32 2147483647, %v2105_v20  ;;  %v783_v13 = vand.u32 2147483647, %v2108_v21 }
 0x2f0   : > { %1472 = vrcp.f32 %v2112_v35  ;;  %v830_v41 = vand.u32 2147483648, %v2116_v22 }
 0x2f1   : > { %1474 = vrcp.f32 %v2116_v22 }
 0x2f2   : > { %v1465_v23 = vpop.eup %1464  ;;  %1476 = vrcp.f32 %v2134_v60 }
 0x2f3   : > { %v1467_v24 = vpop.eup %1466  ;;  %v730_v25 = vmul.f32 %v1465_v23, %v697_v18  ;;  %vm735_vm9 = vweird.f32 %v1465_v23 }
 0x2f4   : > { %v2119_v31 = vpop.eup %1468  ;;  %v745_v36 = vmul.f32 %v1467_v24, %v698_v19  ;;  %vm736_vm11 = vmor %vm734_vm10, %vm735_vm9  ;;  %vm750_vm13 = vweird.f32 %v1467_v24  ;;  %vm2147_vm9 = vcmp.eq.f32.partialorder %v753_v55, 8.507059e+37 }
 0x2f5   : > { %v2122_v37 = vpop.eup %1470  ;;  %v731_v29 = vsub.f32 1.0, %v730_v25  ;;  %v760_v40 = vmul.f32 %v2119_v31, %v2105_v20  ;;  %vm2143_vm8 = vmor %vm749_vm14, %vm750_vm13  ;;  %vm765_vm10 = vweird.f32 %v2119_v31  ;;  %vm2178_vm14 = vcmp.eq.f32.partialorder %v768_v7, 8.507059e+37 }
 0x2f6   : > { %v746_v10 = vsub.f32 1.0, %v745_v36  ;;  %v775_v44 = vmul.f32 %v2122_v37, %v2108_v21  ;;  %v2128_v48 = vpop.eup %1472  ;;  %vm2174_vm13 = vmor %vm764_vm15, %vm765_vm10  ;;  %vm794_vm10 = vweird.f32 %v2112_v35 }
 0x2f7   : > { %v732_v45 = vmul.f32 %v1465_v23, %v731_v29  ;;  %v761_v33 = vsub.f32 1.0, %v760_v40  ;;  %v2130_v52 = vpop.eup %1474  ;;  %v790_v62 = vmul.f32 %v2128_v48, %v2112_v35  ;;  %v785_v40 = vand.u32 2147483648, %v2108_v21 }
 0x2f8   : > { %v747_v47 = vmul.f32 %v1467_v24, %v746_v10  ;;  %v776_v50 = vsub.f32 1.0, %v775_v44  ;;  %v820_v26 = vmul.f32 %v2130_v52, %v2116_v22 }
 0x2f9   : > { %v733_v49 = vadd.f32 %v1465_v23, %v732_v45  ;;  %v762_v58 = vmul.f32 %v2119_v31, %v761_v33  ;;  %v791_v15 = vsub.f32 1.0, %v790_v62  ;;  %v786_v56 = vor.u32 1.1754944e-38, %v785_v40 }
 0x2fa   : > { %v748_v39 = vadd.f32 %v1467_v24, %v747_v47  ;;  %v777_v1 = vmul.f32 %v2122_v37, %v776_v50  ;;  %v2214_v50 = vpop.eup %1476 }
 0x2fb   : > { %v737_v30 = vsel %vm736_vm11, %v1465_v23, %v733_v49  ;;  %v763_v38 = vadd.f32 %v2119_v31, %v762_v58  ;;  %vm779_vm11 = vweird.f32 %v2108_v21  ;;  %v821_v23 = vsub.f32 1.0, %v820_v26 }
 0x2fc   : > { %v742_v61 = vsel %vm739_vm12, %v741_v53, %v737_v30  ;;  %v752_v8 = vsel %vm2143_vm8, %v1467_v24, %v748_v39  ;;  %vm780_vm12 = vweird.f32 %v2122_v37  ;;  %v778_v19 = vadd.f32 %v2122_v37, %v777_v1 }
 0x2fd   : > { %v743_v0 = vmul.f32 %v2005_v46, %v742_v61  ;;  %v770_v46 = vand.u32 2147483648, %v2105_v20  ;;  %v757_v24 = vsel %vm2147_vm9, %v756_v4, %v752_v8  ;;  %v767_v20 = vsel %vm2174_vm13, %v2119_v31, %v763_v38  ;;  %vm2196_vm15 = vmor %vm779_vm11, %vm780_vm12 }
 0x2fe   : > { %vm2200_vm8 = vcmp.eq.f32.partialorder %v783_v13, 8.507059e+37  ;;  %v792_v45 = vmul.f32 %v2128_v48, %v791_v15  ;;  %v800_v31 = vand.u32 2147483648, %v2112_v35  ;;  %v758_v47 = vmul.f32 %v2003_v43, %v757_v24 }
 0x2ff   : > { %971 = vperm.xlu1 %1429, %v743_v0   ;;  %v771_v29 = vor.u32 1.1754944e-38, %v770_v46  ;;  %v782_v21 = vsel %vm2196_vm15, %v2122_v37, %v778_v19  ;;  %v822_v49 = vmul.f32 %v2130_v52, %v821_v23  ;;  %v828_v30 = vand.u32 2147483647, %v2116_v22 }
 0x300   : > { %v2159_v32 = vpop.xlane.xlu2 %693  ;;  %vm824_vm9 = vweird.f32 %v2116_v22  ;;  %v2224_v43 = vor.u32 1.1754944e-38, %v830_v41  ;;  %vm795_vm11 = vweird.f32 %v2128_v48  ;;  %v787_v37 = vsel %vm2200_vm8, %v786_v56, %v782_v21 }
 0x301   : > { %v2164_v59 = vperm.slane %v2159_v32, 0  ;;  %v2167_v18 = vperm.slane %v2159_v32, 1  ;;  %v2184_v27 = vperm.slane %v2159_v32, 4  ;;  %v2207_v33 = vperm.slane %v2159_v32, 6  ;;  %vm2257_vm13 = vmor %vm794_vm10, %vm795_vm11 }
 0x302   : > { %v2217_v53 = vperm.slane %v2159_v32, 7  ;;  %v772_v55 = vsel %vm2178_vm14, %v771_v29, %v767_v20  ;;  %vm825_vm12 = vweird.f32 %v2130_v52  ;;  %v2232_v39 = vadd.f32 %v2128_v48, %v792_v45 }
 0x303   : > { %1478 = vrcp.f32 %v2164_v59  ;;  %v798_v58 = vand.u32 2147483647, %v2112_v35  ;;  %v773_v62 = vmul.f32 %v2008_v34, %v772_v55  ;;  %v2238_v0 = vadd.f32 %v2130_v52, %v822_v49  ;;  %vm2297_vm5 = vmor %vm824_vm9, %vm825_vm12 }
 0x304   : > { %1480 = vrcp.f32 %v2167_v18  ;;  %v2240_v1 = vor.u32 1.1754944e-38, %v800_v31  ;;  %v2243_v42 = vperm.slane %v2159_v32, 2  ;;  %v805_v4 = vmul.f32 %v2214_v50, %v2134_v60 }
 0x305   : > { %1482 = vrcp.f32 %v2184_v27  ;;  %v873_v34 = vand.u32 2147483647, %v2167_v18  ;;  %v875_v46 = vand.u32 2147483648, %v2167_v18  ;;  %v788_v8 = vmul.f32 %v2023_v57, %v787_v37 }
 0x306   : > { %1484 = vrcp.f32 %v2207_v33  ;;  %v2262_v13 = vperm.slane %v2159_v32, 3  ;;  %v858_v19 = vand.u32 2147483647, %v2164_v59  ;;  %v797_v23 = vsel %vm2257_vm13, %v2128_v48, %v2232_v39 }
 0x307   : > { %976 = vperm.xlu1 %1429, %v758_v47   ;;  %1486 = vrcp.f32 %v2217_v53  ;;  %vm869_vm14 = vweird.f32 %v2167_v18  ;;  %vm854_vm15 = vweird.f32 %v2164_v59  ;;  %v860_v35 = vand.u32 2147483648, %v2164_v59 }
 0x308   : > { %vm2274_vm8 = vcmp.eq.f32.partialorder %v828_v30, 8.507059e+37  ;;  %vm2278_vm10 = vcmp.eq.f32.partialorder %v798_v58, 8.507059e+37  ;;  %1488 = vrcp.f32 %v2243_v42  ;;  %vm2287_vm7 = vcmp.eq.f32.partialorder %v873_v34, 8.507059e+37 }
 0x309   : > { %v1479_v61 = vpop.eup %1478  ;;  %v876_v10 = vor.u32 1.1754944e-38, %v875_v46  ;;  %vm859_vm6 = vcmp.eq.f32.partialorder %v858_v19, 8.507059e+37  ;;  %v861_v55 = vor.u32 1.1754944e-38, %v860_v35  ;;  %v827_v56 = vsel %vm2297_vm5, %v2130_v52, %v2238_v0 }
 0x30a   : > { %v1481_v26 = vpop.eup %1480  ;;  %v850_v3 = vmul.f32 %v1479_v61, %v2164_v59  ;;  %vm855_vm11 = vweird.f32 %v1479_v61  ;;  %v806_v39 = vsub.f32 1.0, %v805_v4  ;;  %1490 = vrcp.f32 %v2262_v13 }
 0x30b   : > { %v865_v7 = vmul.f32 %v1481_v26, %v2167_v18  ;;  %v2269_v57 = vpop.eup %1482  ;;  %vm870_vm13 = vweird.f32 %v1481_v26  ;;  %vm856_vm4 = vmor %vm854_vm15, %vm855_vm11  ;;  %v802_v46 = vsel %vm2278_vm10, %v2240_v1, %v797_v23  ;;  %v2350_v1 = vperm.slane %v2159_v32, 5 }
 0x30c   : > { %v851_v15 = vsub.f32 1.0, %v850_v3  ;;  %v910_v29 = vmul.f32 %v2269_v57, %v2184_v27  ;;  %v2285_v40 = vpop.eup %1484  ;;  %vm871_vm9 = vmor %vm869_vm14, %vm870_vm13  ;;  %vm915_vm12 = vweird.f32 %v2269_v57  ;;  %v807_v38 = vmul.f32 %v2214_v50, %v806_v39 }
 0x30d   : > { %v866_v24 = vsub.f32 1.0, %v865_v7  ;;  %v2291_v44 = vpop.eup %1486  ;;  %v940_v21 = vmul.f32 %v2285_v40, %v2207_v33  ;;  %v803_v23 = vmul.f32 %v2017_v54, %v802_v46  ;;  %v965_v32 = vand.u32 2147483648, %v2217_v53 }
 0x30e   : > { %v852_v48 = vmul.f32 %v1479_v61, %v851_v15  ;;  %v911_v31 = vsub.f32 1.0, %v910_v29  ;;  %v955_v22 = vmul.f32 %v2291_v44, %v2217_v53  ;;  %v2316_v7 = vpop.eup %1488  ;;  %vm960_vm15 = vweird.f32 %v2291_v44 }
 0x30f   : > { %981 = vperm.xlu1 %1429, %v773_v62   ;;  %v867_v20 = vmul.f32 %v1481_v26, %v866_v24  ;;  %v941_v62 = vsub.f32 1.0, %v940_v21  ;;  %v880_v19 = vmul.f32 %v2316_v7, %v2243_v42  ;;  %v808_v35 = vadd.f32 %v2214_v50, %v807_v38 }
 0x310   : > { %v853_v45 = vadd.f32 %v1479_v61, %v852_v48  ;;  %v912_v37 = vmul.f32 %v2269_v57, %v911_v31  ;;  %v956_v3 = vsub.f32 1.0, %v955_v22  ;;  %v2357_v25 = vpop.eup %1490  ;;  %vm959_vm10 = vweird.f32 %v2217_v53  ;;  %v1496_v31 = vld [vmem:[%s1849_s24 + $0x40] sm:$0xff] }
 0x311   : > { %v868_v49 = vadd.f32 %v1481_v26, %v867_v20  ;;  %v942_v15 = vmul.f32 %v2285_v40, %v941_v62  ;;  %v881_v48 = vsub.f32 1.0, %v880_v19  ;;  %v963_v54 = vand.u32 2147483647, %v2217_v53 }
 0x312   : > { %v857_v30 = vsel %vm856_vm4, %v1479_v61, %v853_v45  ;;  %v913_v18 = vadd.f32 %v2269_v57, %v912_v37  ;;  %v920_v61 = vand.u32 2147483648, %v2184_v27  ;;  %vm914_vm4 = vweird.f32 %v2184_v27 }
 0x313   : > { %v872_v59 = vsel %vm871_vm9, %v1481_v26, %v868_v49  ;;  %v862_v58 = vsel %vm859_vm6, %v861_v55, %v857_v30  ;;  %v918_v26 = vand.u32 2147483647, %v2184_v27  ;;  %vm2329_vm5 = vmor %vm914_vm4, %vm915_vm12  ;;  %vm809_vm6 = vweird.f32 %v2134_v60 }
 0x314   : > { %v877_v52 = vsel %vm2287_vm7, %v876_v10, %v872_v59  ;;  %v863_v0 = vmul.f32 %v2050_v12, %v862_v58  ;;  %v832_v12 = vsel %vm2274_vm8, %v2224_v43, %v827_v56  ;;  %v917_v27 = vsel %vm2329_vm5, %v2269_v57, %v913_v18  ;;  %vm2379_vm9 = vmor %vm959_vm10, %vm960_vm15 }
 0x315   : > { %v878_v34 = vmul.f32 %v2044_v6, %v877_v52  ;;  %v957_v6 = vmul.f32 %v2291_v44, %v956_v3  ;;  %v921_v43 = vor.u32 1.1754944e-38, %v920_v61  ;;  %vm810_vm7 = vweird.f32 %v2214_v50 }
 0x316   : > { %1011 = vperm.xlu2 %1430, %v863_v0   ;;  %vm919_vm14 = vcmp.eq.f32.partialorder %v918_v26, 8.507059e+37  ;;  %v943_v36 = vadd.f32 %v2285_v40, %v942_v15  ;;  %vm945_vm8 = vweird.f32 %v2285_v40  ;;  %vm2369_vm11 = vmor %vm809_vm6, %vm810_vm7  ;;  %v815_v20 = vand.u32 2147483648, %v2134_v60 }
 0x317   : > { %1016 = vperm.xlu0 %1428, %v878_v34   ;;  %986 = vperm.xlu1 %1429, %v788_v8   ;;  %v833_v8 = vmul.f32 %v2031_v63, %v832_v12  ;;  %v922_v24 = vsel %vm919_vm14, %v921_v43, %v917_v27  ;;  %v958_v57 = vadd.f32 %v2291_v44, %v957_v6  ;;  %v950_v63 = vand.u32 2147483648, %v2207_v33 }
 0x318   : > { %v923_v41 = vmul.f32 %v2056_v14, %v922_v24  ;;  %vm944_vm13 = vweird.f32 %v2207_v33  ;;  %v948_v10 = vand.u32 2147483647, %v2207_v33  ;;  %v813_v45 = vand.u32 2147483647, %v2134_v60 }
 0x319   : > { %1492 = vrcp.f32 %v2350_v1  ;;  %vm2387_vm12 = vmor %vm944_vm13, %vm945_vm8  ;;  %v962_v14 = vsel %vm2379_vm9, %v2291_v44, %v958_v57  ;;  %v812_v33 = vsel %vm2369_vm11, %v2214_v50, %v808_v35  ;;  %v966_v47 = vor.u32 1.1754944e-38, %v965_v32 }
 0x31a   : > { %v947_v60 = vsel %vm2387_vm12, %v2285_v40, %v943_v36  ;;  %v882_v21 = vmul.f32 %v2316_v7, %v881_v48  ;;  %v895_v49 = vmul.f32 %v2357_v25, %v2262_v13  ;;  %v951_v55 = vor.u32 1.1754944e-38, %v950_v63 }
 0x31b   : > { %vm964_vm4 = vcmp.eq.f32.partialorder %v963_v54, 8.507059e+37  ;;  %v816_v56 = vor.u32 1.1754944e-38, %v815_v20  ;;  %vm949_vm5 = vcmp.eq.f32.partialorder %v948_v10, 8.507059e+37  ;;  %vm814_vm6 = vcmp.eq.f32.partialorder %v813_v45, 8.507059e+37 }
 0x31c   : > { %v967_v44 = vsel %vm964_vm4, %v966_v47, %v962_v14  ;;  %v2404_v50 = vperm.slane %v2100_v9, 7  ;;  %v952_v22 = vsel %vm949_vm5, %v951_v55, %v947_v60  ;;  %v883_v37 = vadd.f32 %v2316_v7, %v882_v21  ;;  %v1497_v60 = vld [vmem:[%s1849_s24] sm:$0xff]  ;;  %v1499_v55 = vld [vmem:[%s1849_s24 + $0x8] sm:$0xff] }
 0x31d   : > { %v817_v30 = vsel %vm814_vm6, %v816_v56, %v812_v33  ;;  %vm885_vm7 = vweird.f32 %v2316_v7  ;;  %v896_v40 = vsub.f32 1.0, %v895_v49  ;;  %v968_v59 = vmul.f32 %v2062_v17, %v967_v44 }
 0x31e   : > { %1001 = vperm.xlu2 %1430, %v833_v8   ;;  %v890_v58 = vand.u32 2147483648, %v2243_v42  ;;  %v953_v62 = vmul.f32 %v2065_v5, %v952_v22  ;;  %v818_v3 = vmul.f32 %v2037_v28, %v817_v30  ;;  %vm884_vm14 = vweird.f32 %v2243_v42 }
 0x31f   : > { %1031 = vperm.xlu0 %1428, %v923_v41   ;;  %991 = vperm.xlu1 %1429, %v803_v23   ;;  %v1493_v39 = vpop.eup %1492  ;;  %v888_v9 = vand.u32 2147483647, %v2243_v42  ;;  %1494 = vrcp.f32 %v2404_v50  ;;  %vm886_vm15 = vmor %vm884_vm14, %vm885_vm7  ;;  %v897_v17 = vmul.f32 %v2357_v25, %v896_v40  ;;  %vm900_vm10 = vweird.f32 %v2357_v25 }
 0x320   : > { %v887_v52 = vsel %vm886_vm15, %v2316_v7, %v883_v37  ;;  %v925_v0 = vmul.f32 %v1493_v39, %v2350_v1  ;;  %v891_v18 = vor.u32 1.1754944e-38, %v890_v58  ;;  %v905_v34 = vand.u32 2147483648, %v2262_v13 }
 0x321   : > { %vm889_vm8 = vcmp.eq.f32.partialorder %v888_v9, 8.507059e+37  ;;  %v898_v28 = vadd.f32 %v2357_v25, %v897_v17  ;;  %vm899_vm11 = vweird.f32 %v2262_v13  ;;  %v903_v7 = vand.u32 2147483647, %v2262_v13  ;;  %v1502_v17 = vld [vmem:[%s1849_s24 + $0x60] sm:$0xff] }
 0x322   : > { %v892_v5 = vsel %vm889_vm8, %v891_v18, %v887_v52  ;;  %v926_v42 = vsub.f32 1.0, %v925_v0  ;;  %vm901_vm13 = vmor %vm899_vm11, %vm900_vm10  ;;  %v906_v6 = vor.u32 1.1754944e-38, %v905_v34  ;;  %vm930_vm12 = vweird.f32 %v1493_v39 }
 0x323   : > { %v893_v26 = vmul.f32 %v2034_v2, %v892_v5  ;;  %v902_v4 = vsel %vm901_vm13, %v2357_v25, %v898_v28  ;;  %vm904_vm9 = vcmp.eq.f32.partialorder %v903_v7, 8.507059e+37  ;;  %v935_v19 = vand.u32 2147483648, %v2350_v1  ;;  %v1503_v5 = vld [vmem:[%s1849_s24 + $0x78] sm:$0xff]  ;;  %v1505_v7 = vld [vmem:[%s1849_s24 + $0x20] sm:$0xff] }
 0x324   : > { %v927_v12 = vmul.f32 %v1493_v39, %v926_v42  ;;  %v907_v38 = vsel %vm904_vm9, %v906_v6, %v902_v4  ;;  %vm929_vm4 = vweird.f32 %v2350_v1  ;;  %v933_v13 = vand.u32 2147483647, %v2350_v1  ;;  %v1504_v42 = vld [vmem:[%s1849_s24 + $0x18] sm:$0xff] }
 0x325   : > { %v1495_v61 = vpop.eup %1494  ;;  %v908_v2 = vmul.f32 %v2059_v16, %v907_v38  ;;  %vm931_vm5 = vmor %vm929_vm4, %vm930_vm12  ;;  %v936_v23 = vor.u32 1.1754944e-38, %v935_v19  ;;  %v845_v35 = vand.u32 2147483648, %v2404_v50  ;;  %vm839_vm14 = vweird.f32 %v2404_v50  ;;  %v1507_v38 = vld [vmem:[%s1849_s24 + $0x28] sm:$0xff] }
 0x326   : > { %1046 = vperm.xlu2 %1430, %v968_v59   ;;  %v835_v46 = vmul.f32 %v1495_v61, %v2404_v50  ;;  %v928_v27 = vadd.f32 %v1493_v39, %v927_v12  ;;  %vm934_vm6 = vcmp.eq.f32.partialorder %v933_v13, 8.507059e+37  ;;  %vm840_vm7 = vweird.f32 %v1495_v61  ;;  %v1500_v59 = vld [vmem:[%s1849_s24 + $0x50] sm:$0xff] }
 0x327   : > { %1041 = vperm.xlu0 %1428, %v953_v62   ;;  %996 = vperm.xlu1 %1429, %v818_v3   ;;  %v843_v16 = vand.u32 2147483647, %v2404_v50  ;;  %vm841_vm15 = vmor %vm839_vm14, %vm840_vm7  ;;  %v846_v36 = vor.u32 1.1754944e-38, %v845_v35  ;;  %v1501_v3 = vld [vmem:[%s1849_s24 + $0x10] sm:$0xff]  ;;  %vm2573_vm10 = vcmask 1044484   ;;  %vm2574_vm11 = vcmask 1045509  }
 0x328   : > { %v836_v15 = vsub.f32 1.0, %v835_v46  ;;  %v932_v43 = vsel %vm931_vm5, %v1493_v39, %v928_v27  ;;  %v1506_v12 = vld [vmem:[%s1849_s24 + $0x70] sm:$0xff]  ;;  %vm2575_vm13 = vcmask 1046534   ;;  %vm2577_vm9 = vmmov %vm2573_vm10 }
 0x329   : > { %v937_v24 = vsel %vm934_vm6, %v936_v23, %v932_v43  ;;  %vm844_vm8 = vcmp.eq.f32.partialorder %v843_v16, 8.507059e+37  ;;  %vm2578_vm12 = vmmov %vm2574_vm11 }
 0x32a   : > { %v837_v8 = vmul.f32 %v1495_v61, %v836_v15  ;;  %v938_v25 = vmul.f32 %v2047_v11, %v937_v24 }
 0x32c   : > { %v838_v57 = vadd.f32 %v1495_v61, %v837_v8 }
 0x32e   : > { %v842_v1 = vsel %vm841_vm15, %v1495_v61, %v838_v57  ;;  %v1508_v57 = vld [vmem:[%s1849_s24 + $0x30] sm:$0xff] }
 0x32f   : > { %1021 = vperm.xlu1 %1429, %v893_v26   ;;  %v847_v32 = vsel %vm844_vm8, %v846_v36, %v842_v1 }
 0x330   : > { %v848_v48 = vmul.f32 %v2020_v51, %v847_v32  ;;  %v1498_v51 = vld [vmem:[%s1849_s24 + $0x48] sm:$0xff] }
 0x337   : > { %1026 = vperm.xlu1 %1429, %v908_v2  }
 0x33f   : > { %1036 = vperm.xlu1 %1429, %v938_v25  }
 0x347   : > { %1006 = vperm.xlu1 %1429, %v848_v48  }
 0x370   : > { %v1012_v20 = vpop.permute.xlu2 %1011 }
 0x371   : > { %v972_v63 = vpop.permute.xlu1 %971  ;;  %v1057_v14 = vmul.f32 %v1496_v31, %v1012_v20 }
 0x372   : > { %v1049_v47 = vmul.f32 %v1497_v60, %v972_v63 }
 0x373   : > { %v1121_v49 = vsel %vm305_vm0, %v1057_v14, 0.0 }
 0x374   : > { %v1122_v44 = vrot.slane %v1121_v49, 4  ;;  %v1065_v50 = vsel %vm305_vm0, %v1049_v47, 0.0 }
 0x375   : > { %v1066_v62 = vrot.slane %v1065_v50, 4 }
 0x376   : > { %v1123_v18 = vadd.f32 %v1122_v44, %v1121_v49 }
 0x377   : > { %v1067_v15 = vadd.f32 %v1066_v62, %v1065_v50 }
 0x378   : > { %v1002_v53 = vpop.permute.xlu2 %1001  ;;  %v1124_v43 = vrot.slane %v1123_v18, 2 }
 0x379   : > { %v977_v54 = vpop.permute.xlu1 %976  ;;  %v1055_v35 = vmul.f32 %v1508_v57, %v1002_v53 }
 0x37a   : > { %v1050_v56 = vmul.f32 %v1499_v55, %v977_v54  ;;  %v1509_v54 = vld [vmem:[%s1849_s24 + $0x58] sm:$0xff] }
 0x37c   : > { %v1072_v40 = vsel %vm305_vm0, %v1050_v56, 0.0 }
 0x37d   : > { %v1073_v26 = vrot.slane %v1072_v40, 4 }
 0x37f   : > { %v1074_v25 = vadd.f32 %v1073_v26, %v1072_v40 }
 0x380   : > { %v1047_v30 = vpop.permute.xlu2 %1046 }
 0x381   : > { %v982_v11 = vpop.permute.xlu1 %981  ;;  %v1064_v28 = vmul.f32 %v1503_v5, %v1047_v30 }
 0x382   : > { %v1051_v9 = vmul.f32 %v1501_v3, %v982_v11 }
 0x383   : > { %v1170_v8 = vsel %vm305_vm0, %v1064_v28, 0.0 }
 0x384   : > { %v1079_v19 = vsel %vm305_vm0, %v1051_v9, 0.0  ;;  %v1171_v20 = vrot.slane %v1170_v8, 4 }
 0x385   : > { %v1080_v32 = vrot.slane %v1079_v19, 4 }
 0x386   : > { %v1172_v56 = vadd.f32 %v1171_v20, %v1170_v8  ;;  %v1511_v20 = vld [vmem:[%s1849_s24 + $0x38] sm:$0xff] }
 0x387   : > { %v1081_v49 = vadd.f32 %v1080_v32, %v1079_v19 }
 0x388   : > { %v1173_v28 = vrot.slane %v1172_v56, 2 }
 0x389   : > { %v987_v29 = vpop.permute.xlu1 %986  ;;  %v1017_v41 = vpop.permute.xlu0 %1016 }
 0x38a   : > { %v1058_v21 = vmul.f32 %v1498_v51, %v1017_v41  ;;  %v1052_v61 = vmul.f32 %v1504_v42, %v987_v29  ;;  %v1068_v29 = vrot.slane %v1067_v15, 2  ;;  %v1107_v51 = vsel %vm305_vm0, %v1055_v35, 0.0 }
 0x38c   : > { %v1128_v22 = vsel %vm305_vm0, %v1058_v21, 0.0  ;;  %v1086_v23 = vsel %vm305_vm0, %v1052_v61, 0.0  ;;  %v1075_v21 = vrot.slane %v1074_v25, 2  ;;  %v1069_v30 = vadd.f32 %v1068_v29, %v1067_v15 }
 0x38d   : > { %v1129_v52 = vrot.slane %v1128_v22, 4 }
 0x38e   : > { %v1070_v15 = vrot.slane %v1069_v30, 1 }
 0x38f   : > { %v1130_v2 = vadd.f32 %v1129_v52, %v1128_v22  ;;  %v1076_v52 = vadd.f32 %v1075_v21, %v1074_v25 }
 0x391   : > { %v992_v10 = vpop.permute.xlu1 %991  ;;  %v1032_v45 = vpop.permute.xlu0 %1031  ;;  %v1131_v41 = vrot.slane %v1130_v2, 2  ;;  %v1077_v19 = vrot.slane %v1076_v52, 1 }
 0x392   : > { %v1061_v0 = vmul.f32 %v1502_v17, %v1032_v45  ;;  %v1053_v4 = vmul.f32 %v1505_v7, %v992_v10  ;;  %v1087_v10 = vrot.slane %v1086_v23, 4  ;;  %v1082_v17 = vrot.slane %v1081_v49, 2 }
 0x393   : > { %v1132_v44 = vadd.f32 %v1131_v41, %v1130_v2 }
 0x394   : > { %v1149_v13 = vsel %vm305_vm0, %v1061_v0, 0.0  ;;  %v1093_v16 = vsel %vm305_vm0, %v1053_v4, 0.0  ;;  %v1088_v50 = vadd.f32 %v1087_v10, %v1086_v23  ;;  %v1083_v2 = vadd.f32 %v1082_v17, %v1081_v49 }
 0x395   : > { %v1150_v48 = vrot.slane %v1149_v13, 4  ;;  %v1094_v45 = vrot.slane %v1093_v16, 4  ;;  %v1133_v42 = vrot.slane %v1132_v44, 1 }
 0x396   : > { %v1089_v61 = vrot.slane %v1088_v50, 2 }
 0x397   : > { %v1151_v55 = vadd.f32 %v1150_v48, %v1149_v13  ;;  %v1134_v8 = vadd.f32 %v1133_v42, %v1132_v44 }
 0x398   : > { %v1090_v23 = vadd.f32 %v1089_v61, %v1088_v50 }
 0x399   : > { %v997_v33 = vpop.permute.xlu1 %996  ;;  %v1042_v39 = vpop.permute.xlu0 %1041  ;;  %v1152_v0 = vrot.slane %v1151_v55, 2 }
 0x39a   : > { %v1063_v46 = vmul.f32 %v1506_v12, %v1042_v39  ;;  %v1054_v27 = vmul.f32 %v1507_v38, %v997_v33  ;;  %v1125_v33 = vadd.f32 %v1124_v43, %v1123_v18  ;;  %v1510_v18 = vld [vmem:[%s1849_s24 + $0x68] sm:$0xff]  ;;  %v1174_v43 = vadd.f32 %v1173_v28, %v1172_v56 }
 0x39b   : > { %v1153_v13 = vadd.f32 %v1152_v0, %v1151_v55  ;;  %v1071_v56 = vadd.f32 %v1070_v15, %v1069_v30 }
 0x39c   : > { %v1163_v1 = vsel %vm305_vm0, %v1063_v46, 0.0  ;;  %v1100_v63 = vsel %vm305_vm0, %v1054_v27, 0.0  ;;  %v1175_v10 = vrot.slane %v1174_v43, 1 }
 0x39d   : > { %v1164_v31 = vrot.slane %v1163_v1, 4  ;;  %v1101_v60 = vrot.slane %v1100_v63, 4  ;;  %v1154_v29 = vrot.slane %v1153_v13, 1 }
 0x39f   : > { %v1165_v40 = vadd.f32 %v1164_v31, %v1163_v1  ;;  %v1102_v62 = vadd.f32 %v1101_v60, %v1100_v63  ;;  %v1091_v31 = vrot.slane %v1090_v23, 1 }
 0x3a1   : > { %v1022_v37 = vpop.permute.xlu1 %1021  ;;  %v1166_v7 = vrot.slane %v1165_v40, 2 }
 0x3a2   : > { %v1059_v58 = vmul.f32 %v1500_v59, %v1022_v37  ;;  %v1095_v37 = vadd.f32 %v1094_v45, %v1093_v16  ;;  %v1126_v59 = vrot.slane %v1125_v33, 1 }
 0x3a3   : > { %v1167_v25 = vadd.f32 %v1166_v7, %v1165_v40 }
 0x3a4   : > { %v1135_v34 = vsel %vm305_vm0, %v1059_v58, 0.0  ;;  %v1108_v58 = vrot.slane %v1107_v51, 4  ;;  %v1096_v26 = vrot.slane %v1095_v37, 2  ;;  %v1127_v57 = vadd.f32 %v1126_v59, %v1125_v33 }
 0x3a5   : > { %v1136_v6 = vrot.slane %v1135_v34, 4  ;;  %v1168_v33 = vrot.slane %v1167_v25, 1 }
 0x3a6   : > { %v1109_v46 = vadd.f32 %v1108_v58, %v1107_v51  ;;  %v1097_v35 = vadd.f32 %v1096_v26, %v1095_v37  ;;  %v1200_v45 = vsel %vm481_vm1, %v1134_v8, %v1127_v57  ;;  %v1092_v37 = vadd.f32 %v1091_v31, %v1090_v23 }
 0x3a7   : > { %v1137_v24 = vadd.f32 %v1136_v6, %v1135_v34  ;;  %v1103_v6 = vrot.slane %v1102_v62, 2 }
 0x3a8   : > { %v1110_v1 = vrot.slane %v1109_v46, 2 }
 0x3a9   : > { %v1027_v36 = vpop.permute.xlu1 %1026  ;;  %v1138_v14 = vrot.slane %v1137_v24, 2 }
 0x3aa   : > { %v1060_v11 = vmul.f32 %v1509_v54, %v1027_v36  ;;  %v1104_v36 = vadd.f32 %v1103_v6, %v1102_v62  ;;  %v1078_v54 = vadd.f32 %v1077_v19, %v1076_v52  ;;  %v1111_v44 = vadd.f32 %v1110_v1, %v1109_v46 }
 0x3ab   : > { %v1139_v39 = vadd.f32 %v1138_v14, %v1137_v24  ;;  %v1169_v62 = vadd.f32 %v1168_v33, %v1167_v25 }
 0x3ac   : > { %v1142_v53 = vsel %vm305_vm0, %v1060_v11, 0.0  ;;  %v1084_v11 = vrot.slane %v1083_v2, 1  ;;  %v1105_v51 = vrot.slane %v1104_v36, 1  ;;  %v1193_v59 = vsel %vm481_vm1, %v1078_v54, %v1071_v56 }
 0x3ad   : > { %v1143_v47 = vrot.slane %v1142_v53, 4  ;;  %v1140_v4 = vrot.slane %v1139_v39, 1  ;;  %v1112_v30 = vrot.slane %v1111_v44, 1  ;;  %vm2576_vm1 = vcmask 1047559  }
 0x3ae   : > { %v1085_v50 = vadd.f32 %v1084_v11, %v1083_v2  ;;  %v1106_v52 = vadd.f32 %v1105_v51, %v1104_v36 }
 0x3af   : > { %v1144_v22 = vadd.f32 %v1143_v47, %v1142_v53  ;;  %v1141_v16 = vadd.f32 %v1140_v4, %v1139_v39  ;;  %v1098_v53 = vrot.slane %v1097_v35, 1  ;;  %v1113_v4 = vadd.f32 %v1112_v30, %v1111_v44 }
 0x3b1   : > { %v1145_v3 = vrot.slane %v1144_v22, 2  ;;  %v1037_v9 = vpop.permute.xlu1 %1036  ;;  %v1201_v60 = vsel %vm483_vm2, %v1141_v16, %v1200_v45  ;;  %v1099_v58 = vadd.f32 %v1098_v53, %v1097_v35 }
 0x3b2   : > { %v1062_v5 = vmul.f32 %v1510_v18, %v1037_v9  ;;  %v1176_v9 = vadd.f32 %v1175_v10, %v1174_v43  ;;  %v1194_v18 = vsel %vm483_vm2, %v1085_v50, %v1193_v59  ;;  %vm2579_vm2 = vmmov %vm2575_vm13 }
 0x3b3   : > { %v1146_v34 = vadd.f32 %v1145_v3, %v1144_v22  ;;  %v1155_v22 = vadd.f32 %v1154_v29, %v1153_v13  ;;  %v1195_v28 = vsel %vm485_vm3, %v1092_v37, %v1194_v18 }
 0x3b4   : > { %v1156_v12 = vsel %vm305_vm0, %v1062_v5, 0.0 }
 0x3b5   : > { %v1147_v38 = vrot.slane %v1146_v34, 1  ;;  %v1157_v27 = vrot.slane %v1156_v12, 4 }
 0x3b7   : > { %v1158_v24 = vadd.f32 %v1157_v27, %v1156_v12  ;;  %v1148_v32 = vadd.f32 %v1147_v38, %v1146_v34  ;;  %v1196_v34 = vsel %vm2577_vm9, %v1099_v58, %v1195_v28 }
 0x3b8   : > { %v1197_v26 = vsel %vm2578_vm12, %v1106_v52, %v1196_v34 }
 0x3b9   : > { %v1159_v48 = vrot.slane %v1158_v24, 2  ;;  %v1007_v63 = vpop.permute.xlu1 %1006  ;;  %v1202_v21 = vsel %vm485_vm3, %v1148_v32, %v1201_v60  ;;  %v1198_v46 = vsel %vm2579_vm2, %v1113_v4, %v1197_v26  ;;  %vm2580_vm3 = vmmov %vm2576_vm1 }
 0x3ba   : > { %v1056_v41 = vmul.f32 %v1511_v20, %v1007_v63  ;;  %v1203_v3 = vsel %vm2573_vm10, %v1155_v22, %v1202_v21 }
 0x3bb   : > { %v1160_v14 = vadd.f32 %v1159_v48, %v1158_v24 }
 0x3bc   : > { %v1114_v47 = vsel %vm305_vm0, %v1056_v41, 0.0 }
 0x3bd   : > { %v1161_v49 = vrot.slane %v1160_v14, 1  ;;  %v1115_v55 = vrot.slane %v1114_v47, 4 }
 0x3bf   : > { %v1162_v40 = vadd.f32 %v1161_v49, %v1160_v14  ;;  %v1116_v39 = vadd.f32 %v1115_v55, %v1114_v47 }
 0x3c1   : > { %v1204_v17 = vsel %vm2574_vm11, %v1162_v40, %v1203_v3  ;;  %v1117_v0 = vrot.slane %v1116_v39, 2 }
 0x3c2   : > { %v1205_v5 = vsel %vm2575_vm13, %v1169_v62, %v1204_v17 }
 0x3c3   : > { %v1206_v42 = vsel %vm2576_vm1, %v1176_v9, %v1205_v5  ;;  %v1118_v61 = vadd.f32 %v1117_v0, %v1116_v39 }
 0x3c4   : > { %1210 = vst.msk [vmem:[%s275_s19 + $0x8] sm:$0xff] %vm305_vm0, %v1206_v42 }
 0x3c5   : > { %v1119_v7 = vrot.slane %v1118_v61, 1 }
 0x3c7   : > { %v1120_v12 = vadd.f32 %v1119_v7, %v1118_v61 }
 0x3c9   : > { %v1199_v6 = vsel %vm2580_vm3, %v1120_v12, %v1198_v46 }
 0x3ca   : > { %1209 = vst.msk [vmem:[%s275_s19] sm:$0xff] %vm305_vm0, %v1199_v6 }
 0x3cb   : > { %1629 = shalt.err (!%p1626_p9)
}
 0x3cc   : > { %s1682_s2 = smov 128   ;;  %s1683_s27 = smov 8  }
 0x3cd   : > { %1369 = dma.vmem_to_hbm [thread:$0]  (%p1779_p7), %s1225_s20, 256, %s1227_s23, %s1212_s25, %s1682_s2, %s1682_s2, %s1683_s27  }
 0x3ce PF: > { %s1241_s10 = sand.u32 1, %s1664_s15   ;;  %p2581_p12 = scmp.ge.s32.totalorder %s1676_s18, 2 }
 0x3cf   : > { %s1242_s24 = scalar_lea.sflag [#allocation4], %s1241_s10 }
 0x3d0   : > { %p1383_p13 = pnand %p2581_p12, %p1744_p6 }
 0x3d2   : > { %p1384_p0 = pneg %p1383_p13 }
 0x3d4   : > { %1659 = dma.done.wait (%p1384_p0), %s1242_s24, 256  }
 0x3d5   : > { %1661 = vsyncadd (%p1384_p0), %s1242_s24, 4294967040  ;;  %s2582_s21 = sld [smem:[#allocation13_spill]]  ;;  %p20_p3 = scmp.ge.s32.totalorder %s1762_s29, 4  }
 0x3d6   : > { %s2583_s17 = sld [smem:[#allocation14_spill]]  ;;  %s2584_s15 = smov %s1668_s16 }
 0x3d7   : > { %s2586_s18 = smov %s1762_s29  ;;  %22 = sbr.rel (!%p20_p3) target bundleno = 9 (0x9), region = 98 }
 0x3db   : > { %s2585_s16 = smov %s2582_s21 }
 0x3dc   :  { %1248 = vsyncpa [#allocation3], 1 }
 0x3dd   :  { %1250 = vsyncpa [#allocation3 + $0x1], 1 }
 0x3de   :  { %1251 = vsyncpa [#allocation6], 1 }
 0x3df   :  { %1253 = vsyncpa [#allocation6 + $0x1], 1 }
 0x3e0   :  { %1254 = vsyncpa [#allocation4], 1 }
 0x3e1   :  { %1256 = vsyncpa [#allocation4 + $0x1], 1 }

// kernel: tpu_custom_call.1
= control target key start
LH: loop header
LB: loop body
LE: loop exit
PB: predicated region body
PF: predicated region fallthrough
CT: control target
= control target key end

     0   :  { %s2518_s0 = inlined_call_operand.hbm [shape: f32[32,32], index: 0, kind: input, shape index: {}]   ;;  %s2519_s1 = inlined_call_operand.hbm [shape: f32[32,8,32], index: 1, kind: input, shape index: {}]   ;;  %s2520_s2 = inlined_call_operand.hbm [shape: f32[32,32], index: 2, kind: input, shape index: {}]   ;;  %s2521_s3 = inlined_call_operand.vmem [shape: f32[1,32], index: 3, kind: input, shape index: {}]   ;;  %s2522_s4 = inlined_call_operand.hbm [shape: f32[32,32], index: 4, kind: output, shape index: {}]  }
   0x1   :  { %2532 = sst [smem:[#allocation15_spill]] %s2520_s2 }
   0x2   :  { %9 = vsyncpa [#allocation3], 0 }
   0x3   :  { %11 = vsyncpa [#allocation3 + $0x1], 0 }
   0x4   :  { %12 = vsyncpa [#allocation6], 0 }
   0x5   :  { %14 = vsyncpa [#allocation6 + $0x1], 0 }
   0x6   :  { %15 = vsyncpa [#allocation4], 0 }
   0x7   :  { %17 = vsyncpa [#allocation4 + $0x1], 0  ;;  %s1709_s15 = smov 0   ;;  %s1711_s16 = smov 0  }
   0x8   :  { %s1713_s17 = smov 0   ;;  %s1715_s18 = smov 0  }
   0x9 LB: > { %2533 = sst [smem:[#allocation13_spill]] %s1672_s17  ;;  %s1730_s19 = sadd.s32 4294967295, %s1676_s18   ;;  %s1676_s18 = sphi %s1715_s18, %s2586_s18   ;;  %s1672_s17 = sphi %s1713_s17, %s2583_s17   ;;  %s1668_s16 = sphi %s1711_s16, %s2585_s16   ;;  %s1664_s15 = sphi %s1709_s15, %s2584_s15  }
   0xa   : > { %s1332_s20 = sadd.s32 4294967294, %s1676_s18   ;;  %p43_p0 = scmp.ne.s32.totalorder %s1668_s16, %s1664_s15 }
   0xb   : > { %p44_p1 = scmp.eq.s32.totalorder %s1730_s19, 0  ;;  %p135_p2 = scmp.eq.s32.totalorder %s1730_s19, 1 }
   0xc   : > { %p141_p3 = scmp.eq.s32.totalorder %s1332_s20, 1  ;;  %p1333_p5 = scmp.ge.s32.totalorder %s1676_s18, 1 }
   0xd   : > { %p1739_p4 = por %p44_p1, %p43_p0  ;;  %p148_p7 = scmp.lt.s32.totalorder %s1676_s18, 3 }
   0xe   : > { %p1744_p6 = por %p141_p3, %p43_p0  ;;  %s2536_s2 = sld [smem:[#allocation15_spill]] }
   0xf   : > { %p1752_p8 = pnand %p1333_p5, %p148_p7  ;;  %s1678_s27 = smov [#allocation7]  }
  0x10   : > { %s161_s28 = sshll.u32 %s1678_s27, 4  ;;  %s1762_s29 = sadd.s32 1, %s1676_s18   ;;  %s162_s28 = int_to_ptr.vmem [resolvable:$true] %s161_s28 }
  0x11   : > { %p1371_p9 = pneg %p1752_p8  ;;  %s2523_s30 = smov 128  }
  0x12   : > { %s2525_s5 = smov 8   ;;  %s27_s6 = ssub.s32 %s1676_s18, %s1762_s29 }
  0x13   : > { %p1372_p10 = pnand %p1371_p9, %p44_p1  ;;  %s30_s7 = sadd.s32 1, %s1672_s17 }
  0x14   : > { %s159_s25 = sshll.u32 %s2536_s2, 4  ;;  %p28_p12 = scmp.eq.s32.totalorder %s27_s6, 0  ;;  %s160_s25 = int_to_ptr.hbm [resolvable:$true] %s159_s25 }
  0x15   : > { %1374 = dma.hbm_to_vmem [thread:$0]  (!%p1372_p10), %s160_s25, 512, %s162_s28, [#allocation6], %s2523_s30, %s2523_s30, %s2525_s5  }
  0x16   : > { %p37_p13 = scmp.ne.s32.totalorder %s1672_s17, %s1668_s16  ;;  %p38_p0 = scmp.eq.s32.totalorder %s1676_s18, 0 }
  0x17   : > { %p1387_p3 = scmp.lt.s32.totalorder %s1676_s18, 2  ;;  %s1784_s10 = sand.u32 1, %s1672_s17  }
  0x18   : > { %s1775_s8 = scalar_select %p28_p12, %s1672_s17, %s30_s7  }
  0x19   : > { %p39_p5 = por %p38_p0, %p37_p13  ;;  %p1779_p7 = por %p135_p2, %p37_p13 }
  0x1a   : > { %2538 = sst [smem:[#allocation14_spill]] %s1775_s8  ;;  %s1354_s11 = sshll.u32 %s1676_s18, 4 }
  0x1b   : > { %s1336_s12 = sshll.u32 %s1784_s10, 4  ;;  %s187_s20 = scalar_lea.hbm %s2518_s0, %s1354_s11 }
  0x1c   : > { %s188_s23 = sshll.u32 %s187_s20, 4  ;;  %s182_s24 = scalar_lea.vmem [#allocation2], %s1336_s12  ;;  %s189_s23 = int_to_ptr.hbm [resolvable:$true] %s188_s23 }
  0x1d   : > { %s190_s25 = sshll.u32 %s182_s24, 4  ;;  %p1793_p2 = pnand %p1387_p3, %p39_p5  ;;  %s191_s25 = int_to_ptr.vmem [resolvable:$true] %s190_s25 }
  0x1e   : > { %s200_s28 = sand.u32 1, %s1676_s18   ;;  %s1339_s6 = sshll.u32 %s1784_s10, 7 }
  0x1f   : > { %s179_s7 = scalar_lea.sflag [#allocation3], %s1784_s10  ;;  %s1542_s30 = sshra.s32 %s189_s23, 4  ;;  %s1543_s30 = int_to_ptr.hbm [resolvable:$true] %s1542_s30 }
  0x20   : > { %s1544_s5 = scalar_lea.hbm %s1543_s30, 16  ;;  %p1546_p10 = pneg %p1793_p2 }
  0x21   : > { %p1545_p9 = scmp.ne.s32.totalorder %s1543_s30, %s1544_s5  ;;  %s1549_s13 = scalar_lea.hbm %s2518_s0, 32 }
  0x22   : > { %p1550_p0 = scmp.lt.s32.totalorder %s1543_s30, %s2518_s0  ;;  %p1551_p3 = scmp.lt.s32.totalorder %s1549_s13, %s1544_s5 }
  0x23   : > { %p1547_p12 = pnand %p1546_p10, %p1545_p9 }
  0x24   : > { %p1552_p5 = por %p1551_p3, %p1550_p0 }
  0x25   : > { %p1548_p13 = pneg %p1547_p12 }
  0x27   : > { %p1553_p11 = pnand %p1552_p5, %p1548_p13 }
  0x29   : > { %1556 = shalt.err (!%p1553_p11)
}
  0x2a   : > { %s2541_s10 = smov 8   ;;  %s2542_s24 = smov 128  }
  0x2b   : > { %1378 = dma.hbm_to_vmem [thread:$0]  (!%p1793_p2), %s189_s23, 256, %s191_s25, %s179_s7, %s2542_s24, %s2542_s24, %s2541_s10  }
  0x2c   : > { %s1355_s2 = sshll.u32 %s1676_s18, 7  ;;  %s204_s8 = scalar_lea.vmem [#allocation5], %s1339_s6 }
  0x2d   : > { %s212_s11 = sshll.u32 %s204_s8, 4  ;;  %s209_s14 = scalar_lea.hbm %s2519_s1, %s1355_s2  ;;  %s213_s11 = int_to_ptr.vmem [resolvable:$true] %s212_s11 }
  0x2e   : > { %s210_s30 = sshll.u32 %s209_s14, 4  ;;  %s201_s5 = scalar_lea.sflag [#allocation6], %s200_s28  ;;  %s211_s30 = int_to_ptr.hbm [resolvable:$true] %s210_s30 }
  0x2f   : > { %s1572_s13 = sshra.s32 %s211_s30, 4  ;;  %s1579_s8 = scalar_lea.hbm %s2519_s1, 256  ;;  %s1573_s13 = int_to_ptr.hbm [resolvable:$true] %s1572_s13 }
  0x30   : > { %s1574_s20 = scalar_lea.hbm %s1573_s13, 128  ;;  %p1580_p13 = scmp.lt.s32.totalorder %s1573_s13, %s2519_s1 }
  0x31   : > { %p1575_p11 = scmp.ne.s32.totalorder %s1573_s13, %s1574_s20  ;;  %p1581_p0 = scmp.lt.s32.totalorder %s1579_s8, %s1574_s20 }
  0x33   : > { %p1577_p9 = pnand %p1575_p11, %p1546_p10  ;;  %p1582_p3 = por %p1581_p0, %p1580_p13 }
  0x35   : > { %p1578_p12 = pneg %p1577_p9 }
  0x37   : > { %p1583_p5 = pnand %p1582_p3, %p1578_p12 }
  0x39   : > { %1586 = shalt.err (!%p1583_p5)
}
  0x3a   : > { %1381 = dma.hbm_to_vmem [thread:$0]  (!%p1793_p2), %s211_s30, 2048, %s213_s11, %s201_s5, %s2542_s24, %s2542_s24, %s2541_s10  }
  0x3b   : > { %224 = sbr.rel (%p1752_p8) target bundleno = 974 (0x3ce), region = 36  ;;  %s1837_s2 = sand.u32 (!%p1752_p8), 1, %s1668_s16  }
  0x3c   : > { %s1343_s17 = sshll.u32 (!%p1752_p8), %s1837_s2, 4  ;;  %s227_s28 = scalar_lea.sflag (!%p1752_p8), [#allocation3], %s1837_s2 }
  0x3d   : > { %s230_s12 = scalar_lea.vmem (!%p1752_p8), [#allocation2], %s1343_s17 }
  0x40   : > { %1647 = dma.done.wait (%p1739_p4), %s227_s28, 256  }
  0x41   : > { %1649 = vsyncadd (%p1739_p4), %s227_s28, 4294967040  ;;  %s236_s26 = sand.u32 1, %s1730_s19   ;;  %s1344_s27 = sshll.u32 %s1837_s2, 7 }
  0x42   : > { %s237_s10 = scalar_lea.sflag [#allocation6], %s236_s26  ;;  %s1849_s24 = scalar_lea.vmem [#allocation5], %s1344_s27 }
  0x43   : > { %1651 = dma.done.wait (%p1739_p4), %s237_s10, 2048  }
  0x44   : > { %1653 = vsyncadd (%p1739_p4), %s237_s10, 4294965248 }
  0x45   : > { %1655 = dma.done.wait (%p44_p1), [#allocation6], 512  }
  0x46   : > { %1657 = vsyncadd (%p44_p1), [#allocation6], 4294966784  ;;  %v300_v0 = vld [vmem:[#allocation7 + $0x18] sm:$0xff]  ;;  %v299_v1 = vld [vmem:[#allocation7 + $0x10] sm:$0xff]  ;;  %vm305_vm0 = vcmask 261120   ;;  %vm481_vm1 = vcmask 1041409  }
  0x47   : > { %324 = vmatpush.msra.mxu0 %v300_v0  ;;  %1357 = vmatpush.msra.mxu1 %v300_v0  ;;  %v298_v2 = vld [vmem:[#allocation7 + $0x8] sm:$0xff]  ;;  %v297_v3 = vld [vmem:[#allocation7] sm:$0xff]  ;;  %v281_v17 = vld [vmem:[%s1849_s24 + $0x10] sm:$0xff]  ;;  %vm483_vm2 = vcmask 1042434   ;;  %vm485_vm3 = vcmask 1043459   ;;  %vm2531_vm4 = vcmask 1044484  }
  0x48   : > { %v295_v4 = vld [vmem:[%s230_s12] sm:$0xff]  ;;  %v296_v5 = vld [vmem:[%s230_s12 + $0x8] sm:$0xff]  ;;  %vm2530_vm5 = vcmask 1045509   ;;  %vm2529_vm6 = vcmask 1046534   ;;  %vm2528_vm7 = vcmask 1047559   ;;  %vm504_vm8 = vcmask 64512  }
  0x49   : > { %325 = vmatpush.msra.mxu0 %v299_v1  ;;  %1358 = vmatpush.msra.mxu1 %v299_v1  ;;  %v1431_v6 = vld [vmem:[%s2521_s3] ss:$0 sm:$0xff]  ;;  %v288_v24 = vld [vmem:[%s1849_s24 + $0x48] sm:$0xff]  ;;  %v289_v31 = vld [vmem:[%s1849_s24 + $0x50] sm:$0xff]  ;;  %s1356_s14 = sshll.u32 %s1730_s19, 4  ;;  %s275_s19 = scalar_lea.vmem [#allocation8], %s1343_s17 }
  0x4a   : > { %v287_v11 = vld [vmem:[%s1849_s24 + $0x40] sm:$0xff]  ;;  %v280_v30 = vld [vmem:[%s1849_s24 + $0x8] sm:$0xff]  ;;  %v290_v44 = vld [vmem:[%s1849_s24 + $0x58] sm:$0xff]  ;;  %s1223_s13 = scalar_lea.hbm %s2522_s4, %s1356_s14  ;;  %s1224_s20 = sshll.u32 %s275_s19, 4  ;;  %s1225_s20 = int_to_ptr.vmem [resolvable:$true] %s1224_s20 }
  0x4b   : > { %326 = vmatpush.msra.mxu0 %v298_v2  ;;  %1359 = vmatpush.msra.mxu1 %v298_v2  ;;  %v279_v12 = vld [vmem:[%s1849_s24] sm:$0xff]  ;;  %v282_v45 = vld [vmem:[%s1849_s24 + $0x18] sm:$0xff]  ;;  %v284_v58 = vld [vmem:[%s1849_s24 + $0x28] sm:$0xff]  ;;  %s1226_s23 = sshll.u32 %s1223_s13, 4  ;;  %s1212_s25 = scalar_lea.sflag [#allocation4], %s1837_s2  ;;  %s1227_s23 = int_to_ptr.hbm [resolvable:$true] %s1226_s23 }
  0x4c   : > { %v283_v47 = vld [vmem:[%s1849_s24 + $0x20] sm:$0xff]  ;;  %v292_v62 = vld [vmem:[%s1849_s24 + $0x68] sm:$0xff]  ;;  %s1616_s8 = sshra.s32 %s1227_s23, 4  ;;  %s1622_s28 = scalar_lea.hbm %s2522_s4, 32  ;;  %s1617_s8 = int_to_ptr.hbm [resolvable:$true] %s1616_s8 }
  0x4d   : > { %327 = vmatpush.msra.mxu0 %v297_v3  ;;  %1360 = vmatpush.msra.mxu1 %v297_v3  ;;  %v291_v59 = vld [vmem:[%s1849_s24 + $0x60] sm:$0xff]  ;;  %s1618_s6 = scalar_lea.hbm %s1617_s8, 16  ;;  %p1623_p2 = scmp.lt.s32.totalorder %s1617_s8, %s2522_s4 }
  0x4e   : > { %1347 = vmatmul.msk.f32.vlgmr.msra.gmra.mxu0 %vm305_vm0, %v295_v4  ;;  %1348 = vmatmul.msk.f32.vlgmr.msra.gmra.mxu1 %vm305_vm0, %v296_v5  ;;  %p1619_p1 = scmp.ne.s32.totalorder %s1617_s8, %s1618_s6  ;;  %p1624_p10 = scmp.lt.s32.totalorder %s1622_s28, %s1618_s6 }
  0x50   : > { %p1620_p4 = pnand %p1619_p1, %p1779_p7  ;;  %p1625_p11 = por %p1624_p10, %p1623_p2 }
  0x52   : > { %p1621_p8 = pneg %p1620_p4 }
  0x54   : > { %p1626_p9 = pnand %p1625_p11, %p1621_p8 }
  0xcb   : > { %v329_v7 = vpop.f32.mrf.mxu0  ;;  %v332_v8 = vpop.f32.mrf.mxu1 }
  0xcc   : > { %v1864_v9 = vadd.f32 %v1431_v6, %v329_v7  ;;  %v1866_v10 = vadd.f32 %v1431_v6, %v332_v8 }
  0xce   : > { %v359_v13 = vperm.slane %v1866_v10, 0  ;;  %v351_v14 = vperm.slane %v1864_v9, 0  ;;  %v338_v15 = vrot.slane %v1864_v9, 2  ;;  %v344_v16 = vrot.slane %v1866_v10, 1 }
  0xcf   : > { %v337_v18 = vrot.slane %v1864_v9, 1  ;;  %v345_v19 = vrot.slane %v1866_v10, 2  ;;  %v346_v36 = vrot.slane %v1866_v10, 3  ;;  %v339_v37 = vrot.slane %v1864_v9, 3 }
  0xd0   : > { %v391_v20 = vmul.f32 %v359_v13, %v287_v11  ;;  %v383_v21 = vmul.f32 %v351_v14, %v279_v12  ;;  %v353_v22 = vperm.slane %v338_v15, 0  ;;  %v360_v23 = vperm.slane %v344_v16, 0  ;;  %v293_v11 = vld [vmem:[%s1849_s24 + $0x70] sm:$0xff]  ;;  %v286_v15 = vld [vmem:[%s1849_s24 + $0x38] sm:$0xff] }
  0xd1   : > { %v352_v25 = vperm.slane %v337_v18, 0  ;;  %v361_v29 = vperm.slane %v345_v19, 0  ;;  %v340_v39 = vrot.slane %v1864_v9, 4  ;;  %v362_v42 = vperm.slane %v346_v36, 0  ;;  %v285_v12 = vld [vmem:[%s1849_s24 + $0x30] sm:$0xff] }
  0xd2   : > { %v423_v26 = vsel %vm305_vm0, %v391_v20, 0.0  ;;  %v399_v27 = vsel %vm305_vm0, %v383_v21, 0.0  ;;  %v385_v28 = vmul.f32 %v353_v22, %v281_v17  ;;  %v392_v33 = vmul.f32 %v360_v23, %v288_v24  ;;  %v294_v22 = vld [vmem:[%s1849_s24 + $0x78] sm:$0xff] }
  0xd3   : > { %424 = vadd.xlane.f32.xlu1 %v423_v26  ;;  %400 = vadd.xlane.f32.xlu0 %v399_v27  ;;  %v384_v34 = vmul.f32 %v352_v25, %v280_v30  ;;  %v393_v35 = vmul.f32 %v361_v29, %v289_v31  ;;  %v354_v43 = vperm.slane %v339_v37, 0  ;;  %v355_v46 = vperm.slane %v340_v39, 0 }
  0xd4   : > { %v405_v32 = vsel %vm305_vm0, %v385_v28, 0.0  ;;  %v426_v38 = vsel %vm305_vm0, %v392_v33, 0.0  ;;  %v394_v48 = vmul.f32 %v362_v42, %v290_v44  ;;  %v341_v50 = vrot.slane %v1864_v9, 5 }
  0xd5   : > { %406 = vadd.xlane.f32.xlu2 %v405_v32  ;;  %v402_v40 = vsel %vm305_vm0, %v384_v34, 0.0  ;;  %v429_v41 = vsel %vm305_vm0, %v393_v35, 0.0  ;;  %v386_v49 = vmul.f32 %v354_v43, %v282_v45  ;;  %v347_v51 = vrot.slane %v1866_v10, 4 }
  0xd6   : > { %v387_v52 = vmul.f32 %v355_v46, %v283_v47  ;;  %v348_v53 = vrot.slane %v1866_v10, 5  ;;  %v432_v54 = vsel %vm305_vm0, %v394_v48, 0.0  ;;  %v356_v56 = vperm.slane %v341_v50, 0 }
  0xd7   : > { %v408_v55 = vsel %vm305_vm0, %v386_v49, 0.0  ;;  %v363_v57 = vperm.slane %v347_v51, 0  ;;  %v349_v1 = vrot.slane %v1866_v10, 6  ;;  %v342_v2 = vrot.slane %v1864_v9, 6 }
  0xd8   : > { %v411_v60 = vsel %vm305_vm0, %v387_v52, 0.0  ;;  %v364_v61 = vperm.slane %v348_v53, 0  ;;  %v388_v63 = vmul.f32 %v356_v56, %v284_v58  ;;  %v343_v4 = vrot.slane %v1864_v9, 7 }
  0xd9   : > { %v395_v0 = vmul.f32 %v363_v57, %v291_v59  ;;  %v365_v7 = vperm.slane %v349_v1, 0  ;;  %v357_v8 = vperm.slane %v342_v2, 0  ;;  %v350_v9 = vrot.slane %v1866_v10, 7 }
  0xda   : > { %v396_v3 = vmul.f32 %v364_v61, %v292_v62  ;;  %v414_v5 = vsel %vm305_vm0, %v388_v63, 0.0  ;;  %v358_v14 = vperm.slane %v343_v4, 0  ;;  %v463_v31 = vlaneseq }
  0xdb   : > { %427 = vadd.xlane.f32.xlu1 %v426_v38  ;;  %403 = vadd.xlane.f32.xlu0 %v402_v40  ;;  %v435_v6 = vsel %vm305_vm0, %v395_v0, 0.0  ;;  %v397_v16 = vmul.f32 %v365_v7, %v293_v11  ;;  %v389_v17 = vmul.f32 %v357_v8, %v285_v12  ;;  %v366_v21 = vperm.slane %v350_v9, 0 }
  0xdc   : > { %v438_v13 = vsel %vm305_vm0, %v396_v3, 0.0  ;;  %v390_v18 = vmul.f32 %v358_v14, %v286_v15  ;;  %v1934_v35 = vand.u32 127, %v463_v31 }
  0xdd   : > { %430 = vadd.xlane.f32.xlu2 %v429_v41  ;;  %v441_v19 = vsel %vm305_vm0, %v397_v16, 0.0  ;;  %v417_v20 = vsel %vm305_vm0, %v389_v17, 0.0  ;;  %v398_v24 = vmul.f32 %v366_v21, %v294_v22 }
  0xde   : > { %v420_v23 = vsel %vm305_vm0, %v390_v18, 0.0 }
  0xdf   : > { %v444_v25 = vsel %vm305_vm0, %v398_v24, 0.0 }
  0xe3   : > { %433 = vadd.xlane.f32.xlu1 %v432_v54  ;;  %409 = vadd.xlane.f32.xlu0 %v408_v55 }
  0xe5   : > { %412 = vadd.xlane.f32.xlu2 %v411_v60 }
  0xeb   : > { %415 = vadd.xlane.f32.xlu1 %v414_v5  ;;  %436 = vadd.xlane.f32.xlu0 %v435_v6 }
  0xed   : > { %439 = vadd.xlane.f32.xlu2 %v438_v13  ;;  %v1681_v13 = vmov 0  }
  0xee   : > { %1430 = vset.pattern.permute.xlu2 %v1681_v13  ;;  %1429 = vset.pattern.permute.xlu1 %v1681_v13 }
  0xef   : > { %1428 = vset.pattern.permute.xlu0 %v1681_v13 }
  0xf3   : > { %442 = vadd.xlane.f32.xlu1 %v441_v19  ;;  %418 = vadd.xlane.f32.xlu0 %v417_v20 }
  0xf5   : > { %421 = vadd.xlane.f32.xlu2 %v420_v23 }
  0xfb   : > { %445 = vadd.xlane.f32.xlu0 %v444_v25 }
 0x146   : > { %v1916_v26 = vpop.xlane.xlu1 %424  ;;  %v1918_v27 = vpop.xlane.xlu0 %400 }
 0x147   : > { %v465_v37 = vperm.slane %v1918_v27, %v1934_v35  ;;  %v473_v44 = vperm.slane %v1916_v26, %v1934_v35 }
 0x148   : > { %v1920_v10 = vpop.xlane.xlu2 %406 }
 0x149   : > { %v467_v43 = vperm.slane %v1920_v10, %v1934_v35 }
 0x14e   : > { %v1922_v28 = vpop.xlane.xlu1 %427  ;;  %v1924_v29 = vpop.xlane.xlu0 %403 }
 0x14f   : > { %v466_v36 = vperm.slane %v1924_v29, %v1934_v35  ;;  %v474_v45 = vperm.slane %v1922_v28, %v1934_v35 }
 0x150   : > { %v1926_v30 = vpop.xlane.xlu2 %430 }
 0x151   : > { %v482_v40 = vsel %vm481_vm1, %v466_v36, %v465_v37  ;;  %v475_v50 = vperm.slane %v1926_v30, %v1934_v35  ;;  %v495_v52 = vsel %vm481_vm1, %v474_v45, %v473_v44 }
 0x152   : > { %v484_v46 = vsel %vm483_vm2, %v467_v43, %v482_v40 }
 0x153   : > { %v496_v62 = vsel %vm483_vm2, %v475_v50, %v495_v52 }
 0x156   : > { %v1928_v32 = vpop.xlane.xlu1 %433  ;;  %v1930_v33 = vpop.xlane.xlu0 %409 }
 0x157   : > { %v468_v41 = vperm.slane %v1930_v33, %v1934_v35  ;;  %v476_v53 = vperm.slane %v1928_v32, %v1934_v35 }
 0x158   : > { %v1932_v34 = vpop.xlane.xlu2 %412 }
 0x159   : > { %v469_v47 = vperm.slane %v1932_v34, %v1934_v35  ;;  %v486_v48 = vsel %vm485_vm3, %v468_v41, %v484_v46  ;;  %v497_v63 = vsel %vm485_vm3, %v476_v53, %v496_v62 }
 0x15b   : > { %v488_v54 = vsel %vm2531_vm4, %v469_v47, %v486_v48 }
 0x15e   : > { %v1940_v38 = vpop.xlane.xlu0 %436  ;;  %v1942_v39 = vpop.xlane.xlu1 %415 }
 0x15f   : > { %v470_v49 = vperm.slane %v1942_v39, %v1934_v35  ;;  %v477_v56 = vperm.slane %v1940_v38, %v1934_v35 }
 0x160   : > { %v1947_v42 = vpop.xlane.xlu2 %439 }
 0x161   : > { %v490_v58 = vsel %vm2530_vm5, %v470_v49, %v488_v54  ;;  %v478_v0 = vperm.slane %v1947_v42, %v1934_v35  ;;  %v498_v2 = vsel %vm2531_vm4, %v477_v56, %v497_v63 }
 0x163   : > { %v499_v7 = vsel %vm2530_vm5, %v478_v0, %v498_v2 }
 0x166   : > { %v1963_v51 = vpop.xlane.xlu0 %418  ;;  %v1974_v59 = vpop.xlane.xlu1 %442 }
 0x167   : > { %v471_v55 = vperm.slane %v1963_v51, %v1934_v35  ;;  %v479_v3 = vperm.slane %v1974_v59, %v1934_v35 }
 0x168   : > { %v422_v57 = vpop.xlane.xlu2 %421 }
 0x169   : > { %v472_v60 = vperm.slane %v422_v57, %v1934_v35  ;;  %v492_v61 = vsel %vm2529_vm6, %v471_v55, %v490_v58  ;;  %v500_v8 = vsel %vm2529_vm6, %v479_v3, %v499_v7 }
 0x16b   : > { %v494_v1 = vsel %vm2528_vm7, %v472_v60, %v492_v61 }
 0x16c   : > { %v505_v4 = vsel %vm504_vm8, %v494_v1, -inf }
 0x16d   : > { %506 = vmax.xlane.f32.xlu1 %v505_v4 }
 0x16e   : > { %v1987_v5 = vpop.xlane.xlu0 %445 }
 0x16f   : > { %v480_v6 = vperm.slane %v1987_v5, %v1934_v35 }
 0x171   : > { %v501_v11 = vsel %vm2528_vm7, %v480_v6, %v500_v8 }
 0x172   : > { %v508_v12 = vsel %vm504_vm8, %v501_v11, -inf }
 0x173   : > { %509 = vmax.xlane.f32.xlu2 %v508_v12 }
 0x1e0   : > { %v507_v14 = vpop.xlane.xlu1 %506 }
 0x1e1   : > { %v514_v15 = vperm.slane %v507_v14, 1  ;;  %v513_v16 = vperm.slane %v507_v14, 0  ;;  %v515_v17 = vperm.slane %v507_v14, 2  ;;  %v517_v20 = vperm.slane %v507_v14, 4 }
 0x1e2   : > { %v520_v21 = vperm.slane %v507_v14, 7  ;;  %v516_v22 = vperm.slane %v507_v14, 3  ;;  %v518_v45 = vperm.slane %v507_v14, 5 }
 0x1e3   : > { %v546_v9 = vsub.f32 %v1924_v29, %v514_v15  ;;  %v545_v18 = vsub.f32 %v1918_v27, %v513_v16  ;;  %v547_v19 = vsub.f32 %v1920_v10, %v515_v17  ;;  %v549_v31 = vsub.f32 %v1932_v34, %v517_v20 }
 0x1e4   : > { %v552_v36 = vsub.f32 %v422_v57, %v520_v21  ;;  %v548_v29 = vsub.f32 %v1930_v33, %v516_v22  ;;  %v519_v27 = vperm.slane %v507_v14, 6  ;;  %v550_v48 = vsub.f32 %v1942_v39, %v518_v45 }
 0x1e5   : > { %v563_v23 = vmul.f32 1.442695, %v546_v9  ;;  %v561_v24 = vmul.f32 1.442695, %v545_v18  ;;  %v565_v25 = vmul.f32 1.442695, %v547_v19 }
 0x1e6   : > { %v1999_v37 = vpop.xlane.xlu2 %509  ;;  %v569_v40 = vmul.f32 1.442695, %v549_v31  ;;  %v575_v41 = vmul.f32 1.442695, %v552_v36  ;;  %v567_v44 = vmul.f32 1.442695, %v548_v29  ;;  %v551_v33 = vsub.f32 %v1963_v51, %v519_v27 }
 0x1e7   : > { %1432 = vpow2.f32 %v563_v23  ;;  %v523_v10 = vperm.slane %v1999_v37, 2  ;;  %v522_v50 = vperm.slane %v1999_v37, 1  ;;  %v526_v53 = vperm.slane %v1999_v37, 5 }
 0x1e8   : > { %1434 = vpow2.f32 %v561_v24  ;;  %v573_v49 = vmul.f32 1.442695, %v551_v33  ;;  %v571_v55 = vmul.f32 1.442695, %v550_v48  ;;  %v521_v56 = vperm.slane %v1999_v37, 0 }
 0x1e9   : > { %1436 = vpow2.f32 %v565_v25  ;;  %v555_v47 = vsub.f32 %v1926_v30, %v523_v10  ;;  %v554_v30 = vsub.f32 %v1922_v28, %v522_v50  ;;  %v558_v39 = vsub.f32 %v1947_v42, %v526_v53 }
 0x1ea   : > { %1438 = vpow2.f32 %v569_v40  ;;  %v553_v58 = vsub.f32 %v1916_v26, %v521_v56  ;;  %v525_v61 = vperm.slane %v1999_v37, 4  ;;  %v524_v1 = vperm.slane %v1999_v37, 3 }
 0x1eb   : > { %1440 = vpow2.f32 %v575_v41  ;;  %v581_v52 = vmul.f32 1.442695, %v555_v47  ;;  %v579_v60 = vmul.f32 1.442695, %v554_v30  ;;  %v587_v62 = vmul.f32 1.442695, %v558_v39 }
 0x1ec   : > { %1442 = vpow2.f32 %v567_v44  ;;  %v577_v0 = vmul.f32 1.442695, %v553_v58  ;;  %v557_v26 = vsub.f32 %v1940_v38, %v525_v61  ;;  %v556_v42 = vsub.f32 %v1928_v32, %v524_v1 }
 0x1ed   : > { %v2003_v43 = vpop.eup %1432  ;;  %1444 = vpow2.f32 %v573_v49  ;;  %v528_v4 = vperm.slane %v1999_v37, 7  ;;  %v527_v8 = vperm.slane %v1999_v37, 6 }
 0x1ee   : > { %v2005_v46 = vpop.eup %1434  ;;  %613 = vperm.xlu1 %1429, %v2003_v43   ;;  %1446 = vpow2.f32 %v581_v52  ;;  %v585_v3 = vmul.f32 1.442695, %v557_v26  ;;  %v583_v7 = vmul.f32 1.442695, %v556_v42 }
 0x1ef   : > { %v2008_v34 = vpop.eup %1436  ;;  %610 = vperm.xlu0 %1428, %v2005_v46   ;;  %1448 = vpow2.f32 %v571_v55  ;;  %v560_v38 = vsub.f32 %v1987_v5, %v528_v4  ;;  %v559_v32 = vsub.f32 %v1974_v59, %v527_v8 }
 0x1f0   : > { %616 = vperm.xlu2 %1430, %v2008_v34   ;;  %v2017_v54 = vpop.eup %1438  ;;  %1450 = vpow2.f32 %v579_v60 }
 0x1f1   : > { %v2020_v51 = vpop.eup %1440  ;;  %1452 = vpow2.f32 %v587_v62  ;;  %v591_v13 = vmul.f32 1.442695, %v560_v38  ;;  %v589_v15 = vmul.f32 1.442695, %v559_v32 }
 0x1f2   : > { %v2023_v57 = vpop.eup %1442  ;;  %1454 = vpow2.f32 %v577_v0 }
 0x1f3   : > { %v2031_v63 = vpop.eup %1444  ;;  %1456 = vpow2.f32 %v585_v3 }
 0x1f4   : > { %v2034_v2 = vpop.eup %1446  ;;  %1458 = vpow2.f32 %v583_v7 }
 0x1f5   : > { %v2037_v28 = vpop.eup %1448  ;;  %1460 = vpow2.f32 %v591_v13 }
 0x1f6   : > { %622 = vperm.xlu1 %1429, %v2017_v54   ;;  %v2044_v6 = vpop.eup %1450  ;;  %1462 = vpow2.f32 %v589_v15 }
 0x1f7   : > { %631 = vperm.xlu0 %1428, %v2020_v51   ;;  %v2047_v11 = vpop.eup %1452 }
 0x1f8   : > { %619 = vperm.xlu2 %1430, %v2023_v57   ;;  %v2050_v12 = vpop.eup %1454 }
 0x1f9   : > { %v2056_v14 = vpop.eup %1456 }
 0x1fa   : > { %v2059_v16 = vpop.eup %1458 }
 0x1fb   : > { %v2062_v17 = vpop.eup %1460 }
 0x1fc   : > { %v2065_v5 = vpop.eup %1462 }
 0x1fe   : > { %628 = vperm.xlu1 %1429, %v2031_v63  }
 0x1ff   : > { %640 = vperm.xlu0 %1428, %v2034_v2  }
 0x200   : > { %625 = vperm.xlu2 %1430, %v2037_v28  }
 0x206   : > { %637 = vperm.xlu1 %1429, %v2044_v6  }
 0x207   : > { %649 = vperm.xlu0 %1428, %v2047_v11  }
 0x208   : > { %634 = vperm.xlu2 %1430, %v2050_v12  }
 0x20e   : > { %646 = vperm.xlu1 %1429, %v2056_v14  }
 0x210   : > { %643 = vperm.xlu2 %1430, %v2059_v16  }
 0x216   : > { %655 = vperm.xlu1 %1429, %v2062_v17  }
 0x218   : > { %652 = vperm.xlu2 %1430, %v2065_v5  }
 0x24a   : > { %v617_v59 = vpop.permute.xlu2 %616 }
 0x24b   : > { %v659_v25 = vperm.slane %v617_v59, %v1934_v35 }
 0x252   : > { %v620_v9 = vpop.permute.xlu2 %619 }
 0x253   : > { %v660_v37 = vperm.slane %v620_v9, %v1934_v35 }
 0x25a   : > { %v626_v22 = vpop.permute.xlu2 %625 }
 0x25b   : > { %v662_v41 = vperm.slane %v626_v22, %v1934_v35 }
 0x260   : > { %v614_v18 = vpop.permute.xlu1 %613 }
 0x261   : > { %v611_v19 = vpop.permute.xlu0 %610  ;;  %v658_v20 = vperm.slane %v614_v18, %v1934_v35 }
 0x262   : > { %v657_v21 = vperm.slane %v611_v19, %v1934_v35  ;;  %v635_v44 = vpop.permute.xlu2 %634 }
 0x263   : > { %v665_v56 = vperm.slane %v635_v44, %v1934_v35 }
 0x264   : > { %v673_v23 = vsel %vm481_vm1, %v658_v20, %v657_v21 }
 0x265   : > { %v674_v31 = vsel %vm483_vm2, %v659_v25, %v673_v23 }
 0x266   : > { %v675_v29 = vsel %vm485_vm3, %v660_v37, %v674_v31 }
 0x268   : > { %v623_v24 = vpop.permute.xlu1 %622 }
 0x269   : > { %v661_v36 = vperm.slane %v623_v24, %v1934_v35  ;;  %v632_v40 = vpop.permute.xlu0 %631 }
 0x26a   : > { %v664_v33 = vperm.slane %v632_v40, %v1934_v35  ;;  %v644_v30 = vpop.permute.xlu2 %643 }
 0x26b   : > { %v676_v27 = vsel %vm2531_vm4, %v661_v36, %v675_v29  ;;  %v668_v62 = vperm.slane %v644_v30, %v1934_v35 }
 0x26c   : > { %v677_v47 = vsel %vm2530_vm5, %v662_v41, %v676_v27 }
 0x270   : > { %v629_v10 = vpop.permute.xlu1 %628 }
 0x271   : > { %v663_v45 = vperm.slane %v629_v10, %v1934_v35  ;;  %v641_v52 = vpop.permute.xlu0 %640 }
 0x272   : > { %v667_v58 = vperm.slane %v641_v52, %v1934_v35  ;;  %v653_v3 = vpop.permute.xlu2 %652 }
 0x273   : > { %v678_v48 = vsel %vm2529_vm6, %v663_v45, %v677_v47  ;;  %v671_v8 = vperm.slane %v653_v3, %v1934_v35 }
 0x274   : > { %v679_v49 = vsel %vm2528_vm7, %v664_v33, %v678_v48 }
 0x275   : > { %v689_v50 = vsel %vm504_vm8, %v679_v49, 0.0 }
 0x276   : > { %690 = vadd.xlane.f32.xlu0 %v689_v50 }
 0x278   : > { %v638_v53 = vpop.permute.xlu1 %637 }
 0x279   : > { %v666_v55 = vperm.slane %v638_v53, %v1934_v35  ;;  %v650_v1 = vpop.permute.xlu0 %649 }
 0x27a   : > { %v670_v4 = vperm.slane %v650_v1, %v1934_v35 }
 0x27b   : > { %v680_v39 = vsel %vm481_vm1, %v666_v55, %v665_v56 }
 0x27c   : > { %v681_v60 = vsel %vm483_vm2, %v667_v58, %v680_v39 }
 0x27d   : > { %v682_v26 = vsel %vm485_vm3, %v668_v62, %v681_v60 }
 0x280   : > { %v647_v61 = vpop.permute.xlu1 %646 }
 0x281   : > { %v669_v0 = vperm.slane %v647_v61, %v1934_v35 }
 0x283   : > { %v683_v42 = vsel %vm2531_vm4, %v669_v0, %v682_v26 }
 0x284   : > { %v684_v7 = vsel %vm2530_vm5, %v670_v4, %v683_v42 }
 0x285   : > { %v685_v13 = vsel %vm2529_vm6, %v671_v8, %v684_v7 }
 0x288   : > { %v656_v38 = vpop.permute.xlu1 %655 }
 0x289   : > { %v672_v32 = vperm.slane %v656_v38, %v1934_v35 }
 0x28b   : > { %v686_v15 = vsel %vm2528_vm7, %v672_v32, %v685_v13 }
 0x28c   : > { %v692_v59 = vsel %vm504_vm8, %v686_v15, 0.0 }
 0x28d   : > { %693 = vadd.xlane.f32.xlu2 %v692_v59 }
 0x2e9   : > { %v2100_v9 = vpop.xlane.xlu0 %690 }
 0x2ea   : > { %v697_v18 = vperm.slane %v2100_v9, 0  ;;  %v698_v19 = vperm.slane %v2100_v9, 1  ;;  %v2105_v20 = vperm.slane %v2100_v9, 2  ;;  %v2108_v21 = vperm.slane %v2100_v9, 3 }
 0x2eb   : > { %v2112_v35 = vperm.slane %v2100_v9, 4  ;;  %v2116_v22 = vperm.slane %v2100_v9, 6  ;;  %v2134_v60 = vperm.slane %v2100_v9, 5 }
 0x2ec   : > { %1464 = vrcp.f32 %v697_v18  ;;  %v738_v27 = vand.u32 2147483647, %v697_v18  ;;  %v740_v41 = vand.u32 2147483648, %v697_v18  ;;  %vm734_vm10 = vweird.f32 %v697_v18 }
 0x2ed   : > { %1466 = vrcp.f32 %v698_v19  ;;  %v753_v55 = vand.u32 2147483647, %v698_v19  ;;  %v755_v56 = vand.u32 2147483648, %v698_v19  ;;  %vm749_vm14 = vweird.f32 %v698_v19 }
 0x2ee   : > { %1468 = vrcp.f32 %v2105_v20  ;;  %vm739_vm12 = vcmp.eq.f32.partialorder %v738_v27, 8.507059e+37  ;;  %v741_v53 = vor.u32 1.1754944e-38, %v740_v41  ;;  %vm764_vm15 = vweird.f32 %v2105_v20 }
 0x2ef   : > { %1470 = vrcp.f32 %v2108_v21  ;;  %v756_v4 = vor.u32 1.1754944e-38, %v755_v56  ;;  %v768_v7 = vand.u32 2147483647, %v2105_v20  ;;  %v783_v13 = vand.u32 2147483647, %v2108_v21 }
 0x2f0   : > { %1472 = vrcp.f32 %v2112_v35  ;;  %v830_v41 = vand.u32 2147483648, %v2116_v22 }
 0x2f1   : > { %1474 = vrcp.f32 %v2116_v22 }
 0x2f2   : > { %v1465_v23 = vpop.eup %1464  ;;  %1476 = vrcp.f32 %v2134_v60 }
 0x2f3   : > { %v1467_v24 = vpop.eup %1466  ;;  %v730_v25 = vmul.f32 %v1465_v23, %v697_v18  ;;  %vm735_vm9 = vweird.f32 %v1465_v23 }
 0x2f4   : > { %v2119_v31 = vpop.eup %1468  ;;  %v745_v36 = vmul.f32 %v1467_v24, %v698_v19  ;;  %vm736_vm11 = vmor %vm734_vm10, %vm735_vm9  ;;  %vm750_vm13 = vweird.f32 %v1467_v24  ;;  %vm2147_vm9 = vcmp.eq.f32.partialorder %v753_v55, 8.507059e+37 }
 0x2f5   : > { %v2122_v37 = vpop.eup %1470  ;;  %v731_v29 = vsub.f32 1.0, %v730_v25  ;;  %v760_v40 = vmul.f32 %v2119_v31, %v2105_v20  ;;  %vm2143_vm8 = vmor %vm749_vm14, %vm750_vm13  ;;  %vm765_vm10 = vweird.f32 %v2119_v31  ;;  %vm2178_vm14 = vcmp.eq.f32.partialorder %v768_v7, 8.507059e+37 }
 0x2f6   : > { %v746_v10 = vsub.f32 1.0, %v745_v36  ;;  %v775_v44 = vmul.f32 %v2122_v37, %v2108_v21  ;;  %v2128_v48 = vpop.eup %1472  ;;  %vm2174_vm13 = vmor %vm764_vm15, %vm765_vm10  ;;  %vm794_vm10 = vweird.f32 %v2112_v35 }
 0x2f7   : > { %v732_v45 = vmul.f32 %v1465_v23, %v731_v29  ;;  %v761_v33 = vsub.f32 1.0, %v760_v40  ;;  %v2130_v52 = vpop.eup %1474  ;;  %v790_v62 = vmul.f32 %v2128_v48, %v2112_v35  ;;  %v785_v40 = vand.u32 2147483648, %v2108_v21 }
 0x2f8   : > { %v747_v47 = vmul.f32 %v1467_v24, %v746_v10  ;;  %v776_v50 = vsub.f32 1.0, %v775_v44  ;;  %v820_v26 = vmul.f32 %v2130_v52, %v2116_v22 }
 0x2f9   : > { %v733_v49 = vadd.f32 %v1465_v23, %v732_v45  ;;  %v762_v58 = vmul.f32 %v2119_v31, %v761_v33  ;;  %v791_v15 = vsub.f32 1.0, %v790_v62  ;;  %v786_v56 = vor.u32 1.1754944e-38, %v785_v40 }
 0x2fa   : > { %v748_v39 = vadd.f32 %v1467_v24, %v747_v47  ;;  %v777_v1 = vmul.f32 %v2122_v37, %v776_v50  ;;  %v2214_v50 = vpop.eup %1476 }
 0x2fb   : > { %v737_v30 = vsel %vm736_vm11, %v1465_v23, %v733_v49  ;;  %v763_v38 = vadd.f32 %v2119_v31, %v762_v58  ;;  %vm779_vm11 = vweird.f32 %v2108_v21  ;;  %v821_v23 = vsub.f32 1.0, %v820_v26 }
 0x2fc   : > { %v742_v61 = vsel %vm739_vm12, %v741_v53, %v737_v30  ;;  %v752_v8 = vsel %vm2143_vm8, %v1467_v24, %v748_v39  ;;  %vm780_vm12 = vweird.f32 %v2122_v37  ;;  %v778_v19 = vadd.f32 %v2122_v37, %v777_v1 }
 0x2fd   : > { %v743_v0 = vmul.f32 %v2005_v46, %v742_v61  ;;  %v770_v46 = vand.u32 2147483648, %v2105_v20  ;;  %v757_v24 = vsel %vm2147_vm9, %v756_v4, %v752_v8  ;;  %v767_v20 = vsel %vm2174_vm13, %v2119_v31, %v763_v38  ;;  %vm2196_vm15 = vmor %vm779_vm11, %vm780_vm12 }
 0x2fe   : > { %vm2200_vm8 = vcmp.eq.f32.partialorder %v783_v13, 8.507059e+37  ;;  %v792_v45 = vmul.f32 %v2128_v48, %v791_v15  ;;  %v800_v31 = vand.u32 2147483648, %v2112_v35  ;;  %v758_v47 = vmul.f32 %v2003_v43, %v757_v24 }
 0x2ff   : > { %971 = vperm.xlu1 %1429, %v743_v0   ;;  %v771_v29 = vor.u32 1.1754944e-38, %v770_v46  ;;  %v782_v21 = vsel %vm2196_vm15, %v2122_v37, %v778_v19  ;;  %v822_v49 = vmul.f32 %v2130_v52, %v821_v23  ;;  %v828_v30 = vand.u32 2147483647, %v2116_v22 }
 0x300   : > { %v2159_v32 = vpop.xlane.xlu2 %693  ;;  %vm824_vm9 = vweird.f32 %v2116_v22  ;;  %v2224_v43 = vor.u32 1.1754944e-38, %v830_v41  ;;  %vm795_vm11 = vweird.f32 %v2128_v48  ;;  %v787_v37 = vsel %vm2200_vm8, %v786_v56, %v782_v21 }
 0x301   : > { %v2164_v59 = vperm.slane %v2159_v32, 0  ;;  %v2167_v18 = vperm.slane %v2159_v32, 1  ;;  %v2184_v27 = vperm.slane %v2159_v32, 4  ;;  %v2207_v33 = vperm.slane %v2159_v32, 6  ;;  %vm2257_vm13 = vmor %vm794_vm10, %vm795_vm11 }
 0x302   : > { %v2217_v53 = vperm.slane %v2159_v32, 7  ;;  %v772_v55 = vsel %vm2178_vm14, %v771_v29, %v767_v20  ;;  %vm825_vm12 = vweird.f32 %v2130_v52  ;;  %v2232_v39 = vadd.f32 %v2128_v48, %v792_v45 }
 0x303   : > { %1478 = vrcp.f32 %v2164_v59  ;;  %v798_v58 = vand.u32 2147483647, %v2112_v35  ;;  %v773_v62 = vmul.f32 %v2008_v34, %v772_v55  ;;  %v2238_v0 = vadd.f32 %v2130_v52, %v822_v49  ;;  %vm2297_vm5 = vmor %vm824_vm9, %vm825_vm12 }
 0x304   : > { %1480 = vrcp.f32 %v2167_v18  ;;  %v2240_v1 = vor.u32 1.1754944e-38, %v800_v31  ;;  %v2243_v42 = vperm.slane %v2159_v32, 2  ;;  %v805_v4 = vmul.f32 %v2214_v50, %v2134_v60 }
 0x305   : > { %1482 = vrcp.f32 %v2184_v27  ;;  %v873_v34 = vand.u32 2147483647, %v2167_v18  ;;  %v875_v46 = vand.u32 2147483648, %v2167_v18  ;;  %v788_v8 = vmul.f32 %v2023_v57, %v787_v37 }
 0x306   : > { %1484 = vrcp.f32 %v2207_v33  ;;  %v2262_v13 = vperm.slane %v2159_v32, 3  ;;  %v858_v19 = vand.u32 2147483647, %v2164_v59  ;;  %v797_v23 = vsel %vm2257_vm13, %v2128_v48, %v2232_v39 }
 0x307   : > { %976 = vperm.xlu1 %1429, %v758_v47   ;;  %1486 = vrcp.f32 %v2217_v53  ;;  %vm869_vm14 = vweird.f32 %v2167_v18  ;;  %vm854_vm15 = vweird.f32 %v2164_v59  ;;  %v860_v35 = vand.u32 2147483648, %v2164_v59 }
 0x308   : > { %vm2274_vm8 = vcmp.eq.f32.partialorder %v828_v30, 8.507059e+37  ;;  %vm2278_vm10 = vcmp.eq.f32.partialorder %v798_v58, 8.507059e+37  ;;  %1488 = vrcp.f32 %v2243_v42  ;;  %vm2287_vm7 = vcmp.eq.f32.partialorder %v873_v34, 8.507059e+37 }
 0x309   : > { %v1479_v61 = vpop.eup %1478  ;;  %v876_v10 = vor.u32 1.1754944e-38, %v875_v46  ;;  %vm859_vm6 = vcmp.eq.f32.partialorder %v858_v19, 8.507059e+37  ;;  %v861_v55 = vor.u32 1.1754944e-38, %v860_v35  ;;  %v827_v56 = vsel %vm2297_vm5, %v2130_v52, %v2238_v0 }
 0x30a   : > { %v1481_v26 = vpop.eup %1480  ;;  %v850_v3 = vmul.f32 %v1479_v61, %v2164_v59  ;;  %vm855_vm11 = vweird.f32 %v1479_v61  ;;  %v806_v39 = vsub.f32 1.0, %v805_v4  ;;  %1490 = vrcp.f32 %v2262_v13 }
 0x30b   : > { %v865_v7 = vmul.f32 %v1481_v26, %v2167_v18  ;;  %v2269_v57 = vpop.eup %1482  ;;  %vm870_vm13 = vweird.f32 %v1481_v26  ;;  %vm856_vm4 = vmor %vm854_vm15, %vm855_vm11  ;;  %v802_v46 = vsel %vm2278_vm10, %v2240_v1, %v797_v23  ;;  %v2350_v1 = vperm.slane %v2159_v32, 5 }
 0x30c   : > { %v851_v15 = vsub.f32 1.0, %v850_v3  ;;  %v910_v29 = vmul.f32 %v2269_v57, %v2184_v27  ;;  %v2285_v40 = vpop.eup %1484  ;;  %vm871_vm9 = vmor %vm869_vm14, %vm870_vm13  ;;  %vm915_vm12 = vweird.f32 %v2269_v57  ;;  %v807_v38 = vmul.f32 %v2214_v50, %v806_v39 }
 0x30d   : > { %v866_v24 = vsub.f32 1.0, %v865_v7  ;;  %v2291_v44 = vpop.eup %1486  ;;  %v940_v21 = vmul.f32 %v2285_v40, %v2207_v33  ;;  %v803_v23 = vmul.f32 %v2017_v54, %v802_v46  ;;  %v965_v32 = vand.u32 2147483648, %v2217_v53 }
 0x30e   : > { %v852_v48 = vmul.f32 %v1479_v61, %v851_v15  ;;  %v911_v31 = vsub.f32 1.0, %v910_v29  ;;  %v955_v22 = vmul.f32 %v2291_v44, %v2217_v53  ;;  %v2316_v7 = vpop.eup %1488  ;;  %vm960_vm15 = vweird.f32 %v2291_v44 }
 0x30f   : > { %981 = vperm.xlu1 %1429, %v773_v62   ;;  %v867_v20 = vmul.f32 %v1481_v26, %v866_v24  ;;  %v941_v62 = vsub.f32 1.0, %v940_v21  ;;  %v880_v19 = vmul.f32 %v2316_v7, %v2243_v42  ;;  %v808_v35 = vadd.f32 %v2214_v50, %v807_v38 }
 0x310   : > { %v853_v45 = vadd.f32 %v1479_v61, %v852_v48  ;;  %v912_v37 = vmul.f32 %v2269_v57, %v911_v31  ;;  %v956_v3 = vsub.f32 1.0, %v955_v22  ;;  %v2357_v25 = vpop.eup %1490  ;;  %vm959_vm10 = vweird.f32 %v2217_v53  ;;  %v1496_v31 = vld [vmem:[%s1849_s24 + $0x40] sm:$0xff] }
 0x311   : > { %v868_v49 = vadd.f32 %v1481_v26, %v867_v20  ;;  %v942_v15 = vmul.f32 %v2285_v40, %v941_v62  ;;  %v881_v48 = vsub.f32 1.0, %v880_v19  ;;  %v963_v54 = vand.u32 2147483647, %v2217_v53 }
 0x312   : > { %v857_v30 = vsel %vm856_vm4, %v1479_v61, %v853_v45  ;;  %v913_v18 = vadd.f32 %v2269_v57, %v912_v37  ;;  %v920_v61 = vand.u32 2147483648, %v2184_v27  ;;  %vm914_vm4 = vweird.f32 %v2184_v27 }
 0x313   : > { %v872_v59 = vsel %vm871_vm9, %v1481_v26, %v868_v49  ;;  %v862_v58 = vsel %vm859_vm6, %v861_v55, %v857_v30  ;;  %v918_v26 = vand.u32 2147483647, %v2184_v27  ;;  %vm2329_vm5 = vmor %vm914_vm4, %vm915_vm12  ;;  %vm809_vm6 = vweird.f32 %v2134_v60 }
 0x314   : > { %v877_v52 = vsel %vm2287_vm7, %v876_v10, %v872_v59  ;;  %v863_v0 = vmul.f32 %v2050_v12, %v862_v58  ;;  %v832_v12 = vsel %vm2274_vm8, %v2224_v43, %v827_v56  ;;  %v917_v27 = vsel %vm2329_vm5, %v2269_v57, %v913_v18  ;;  %vm2379_vm9 = vmor %vm959_vm10, %vm960_vm15 }
 0x315   : > { %v878_v34 = vmul.f32 %v2044_v6, %v877_v52  ;;  %v957_v6 = vmul.f32 %v2291_v44, %v956_v3  ;;  %v921_v43 = vor.u32 1.1754944e-38, %v920_v61  ;;  %vm810_vm7 = vweird.f32 %v2214_v50 }
 0x316   : > { %1011 = vperm.xlu2 %1430, %v863_v0   ;;  %vm919_vm14 = vcmp.eq.f32.partialorder %v918_v26, 8.507059e+37  ;;  %v943_v36 = vadd.f32 %v2285_v40, %v942_v15  ;;  %vm945_vm8 = vweird.f32 %v2285_v40  ;;  %vm2369_vm11 = vmor %vm809_vm6, %vm810_vm7  ;;  %v815_v20 = vand.u32 2147483648, %v2134_v60 }
 0x317   : > { %1016 = vperm.xlu0 %1428, %v878_v34   ;;  %986 = vperm.xlu1 %1429, %v788_v8   ;;  %v833_v8 = vmul.f32 %v2031_v63, %v832_v12  ;;  %v922_v24 = vsel %vm919_vm14, %v921_v43, %v917_v27  ;;  %v958_v57 = vadd.f32 %v2291_v44, %v957_v6  ;;  %v950_v63 = vand.u32 2147483648, %v2207_v33 }
 0x318   : > { %v923_v41 = vmul.f32 %v2056_v14, %v922_v24  ;;  %vm944_vm13 = vweird.f32 %v2207_v33  ;;  %v948_v10 = vand.u32 2147483647, %v2207_v33  ;;  %v813_v45 = vand.u32 2147483647, %v2134_v60 }
 0x319   : > { %1492 = vrcp.f32 %v2350_v1  ;;  %vm2387_vm12 = vmor %vm944_vm13, %vm945_vm8  ;;  %v962_v14 = vsel %vm2379_vm9, %v2291_v44, %v958_v57  ;;  %v812_v33 = vsel %vm2369_vm11, %v2214_v50, %v808_v35  ;;  %v966_v47 = vor.u32 1.1754944e-38, %v965_v32 }
 0x31a   : > { %v947_v60 = vsel %vm2387_vm12, %v2285_v40, %v943_v36  ;;  %v882_v21 = vmul.f32 %v2316_v7, %v881_v48  ;;  %v895_v49 = vmul.f32 %v2357_v25, %v2262_v13  ;;  %v951_v55 = vor.u32 1.1754944e-38, %v950_v63 }
 0x31b   : > { %vm964_vm4 = vcmp.eq.f32.partialorder %v963_v54, 8.507059e+37  ;;  %v816_v56 = vor.u32 1.1754944e-38, %v815_v20  ;;  %vm949_vm5 = vcmp.eq.f32.partialorder %v948_v10, 8.507059e+37  ;;  %vm814_vm6 = vcmp.eq.f32.partialorder %v813_v45, 8.507059e+37 }
 0x31c   : > { %v967_v44 = vsel %vm964_vm4, %v966_v47, %v962_v14  ;;  %v2404_v50 = vperm.slane %v2100_v9, 7  ;;  %v952_v22 = vsel %vm949_vm5, %v951_v55, %v947_v60  ;;  %v883_v37 = vadd.f32 %v2316_v7, %v882_v21  ;;  %v1497_v60 = vld [vmem:[%s1849_s24] sm:$0xff]  ;;  %v1499_v55 = vld [vmem:[%s1849_s24 + $0x8] sm:$0xff] }
 0x31d   : > { %v817_v30 = vsel %vm814_vm6, %v816_v56, %v812_v33  ;;  %vm885_vm7 = vweird.f32 %v2316_v7  ;;  %v896_v40 = vsub.f32 1.0, %v895_v49  ;;  %v968_v59 = vmul.f32 %v2062_v17, %v967_v44 }
 0x31e   : > { %1001 = vperm.xlu2 %1430, %v833_v8   ;;  %v890_v58 = vand.u32 2147483648, %v2243_v42  ;;  %v953_v62 = vmul.f32 %v2065_v5, %v952_v22  ;;  %v818_v3 = vmul.f32 %v2037_v28, %v817_v30  ;;  %vm884_vm14 = vweird.f32 %v2243_v42 }
 0x31f   : > { %1031 = vperm.xlu0 %1428, %v923_v41   ;;  %991 = vperm.xlu1 %1429, %v803_v23   ;;  %v1493_v39 = vpop.eup %1492  ;;  %v888_v9 = vand.u32 2147483647, %v2243_v42  ;;  %1494 = vrcp.f32 %v2404_v50  ;;  %vm886_vm15 = vmor %vm884_vm14, %vm885_vm7  ;;  %v897_v17 = vmul.f32 %v2357_v25, %v896_v40  ;;  %vm900_vm10 = vweird.f32 %v2357_v25 }
 0x320   : > { %v887_v52 = vsel %vm886_vm15, %v2316_v7, %v883_v37  ;;  %v925_v0 = vmul.f32 %v1493_v39, %v2350_v1  ;;  %v891_v18 = vor.u32 1.1754944e-38, %v890_v58  ;;  %v905_v34 = vand.u32 2147483648, %v2262_v13 }
 0x321   : > { %vm889_vm8 = vcmp.eq.f32.partialorder %v888_v9, 8.507059e+37  ;;  %v898_v28 = vadd.f32 %v2357_v25, %v897_v17  ;;  %vm899_vm11 = vweird.f32 %v2262_v13  ;;  %v903_v7 = vand.u32 2147483647, %v2262_v13  ;;  %v1502_v17 = vld [vmem:[%s1849_s24 + $0x60] sm:$0xff] }
 0x322   : > { %v892_v5 = vsel %vm889_vm8, %v891_v18, %v887_v52  ;;  %v926_v42 = vsub.f32 1.0, %v925_v0  ;;  %vm901_vm13 = vmor %vm899_vm11, %vm900_vm10  ;;  %v906_v6 = vor.u32 1.1754944e-38, %v905_v34  ;;  %vm930_vm12 = vweird.f32 %v1493_v39 }
 0x323   : > { %v893_v26 = vmul.f32 %v2034_v2, %v892_v5  ;;  %v902_v4 = vsel %vm901_vm13, %v2357_v25, %v898_v28  ;;  %vm904_vm9 = vcmp.eq.f32.partialorder %v903_v7, 8.507059e+37  ;;  %v935_v19 = vand.u32 2147483648, %v2350_v1  ;;  %v1503_v5 = vld [vmem:[%s1849_s24 + $0x78] sm:$0xff]  ;;  %v1505_v7 = vld [vmem:[%s1849_s24 + $0x20] sm:$0xff] }
 0x324   : > { %v927_v12 = vmul.f32 %v1493_v39, %v926_v42  ;;  %v907_v38 = vsel %vm904_vm9, %v906_v6, %v902_v4  ;;  %vm929_vm4 = vweird.f32 %v2350_v1  ;;  %v933_v13 = vand.u32 2147483647, %v2350_v1  ;;  %v1504_v42 = vld [vmem:[%s1849_s24 + $0x18] sm:$0xff] }
 0x325   : > { %v1495_v61 = vpop.eup %1494  ;;  %v908_v2 = vmul.f32 %v2059_v16, %v907_v38  ;;  %vm931_vm5 = vmor %vm929_vm4, %vm930_vm12  ;;  %v936_v23 = vor.u32 1.1754944e-38, %v935_v19  ;;  %v845_v35 = vand.u32 2147483648, %v2404_v50  ;;  %vm839_vm14 = vweird.f32 %v2404_v50  ;;  %v1507_v38 = vld [vmem:[%s1849_s24 + $0x28] sm:$0xff] }
 0x326   : > { %1046 = vperm.xlu2 %1430, %v968_v59   ;;  %v835_v46 = vmul.f32 %v1495_v61, %v2404_v50  ;;  %v928_v27 = vadd.f32 %v1493_v39, %v927_v12  ;;  %vm934_vm6 = vcmp.eq.f32.partialorder %v933_v13, 8.507059e+37  ;;  %vm840_vm7 = vweird.f32 %v1495_v61  ;;  %v1500_v59 = vld [vmem:[%s1849_s24 + $0x50] sm:$0xff] }
 0x327   : > { %1041 = vperm.xlu0 %1428, %v953_v62   ;;  %996 = vperm.xlu1 %1429, %v818_v3   ;;  %v843_v16 = vand.u32 2147483647, %v2404_v50  ;;  %vm841_vm15 = vmor %vm839_vm14, %vm840_vm7  ;;  %v846_v36 = vor.u32 1.1754944e-38, %v845_v35  ;;  %v1501_v3 = vld [vmem:[%s1849_s24 + $0x10] sm:$0xff]  ;;  %vm2573_vm10 = vcmask 1044484   ;;  %vm2574_vm11 = vcmask 1045509  }
 0x328   : > { %v836_v15 = vsub.f32 1.0, %v835_v46  ;;  %v932_v43 = vsel %vm931_vm5, %v1493_v39, %v928_v27  ;;  %v1506_v12 = vld [vmem:[%s1849_s24 + $0x70] sm:$0xff]  ;;  %vm2575_vm13 = vcmask 1046534   ;;  %vm2577_vm9 = vmmov %vm2573_vm10 }
 0x329   : > { %v937_v24 = vsel %vm934_vm6, %v936_v23, %v932_v43  ;;  %vm844_vm8 = vcmp.eq.f32.partialorder %v843_v16, 8.507059e+37  ;;  %vm2578_vm12 = vmmov %vm2574_vm11 }
 0x32a   : > { %v837_v8 = vmul.f32 %v1495_v61, %v836_v15  ;;  %v938_v25 = vmul.f32 %v2047_v11, %v937_v24 }
 0x32c   : > { %v838_v57 = vadd.f32 %v1495_v61, %v837_v8 }
 0x32e   : > { %v842_v1 = vsel %vm841_vm15, %v1495_v61, %v838_v57  ;;  %v1508_v57 = vld [vmem:[%s1849_s24 + $0x30] sm:$0xff] }
 0x32f   : > { %1021 = vperm.xlu1 %1429, %v893_v26   ;;  %v847_v32 = vsel %vm844_vm8, %v846_v36, %v842_v1 }
 0x330   : > { %v848_v48 = vmul.f32 %v2020_v51, %v847_v32  ;;  %v1498_v51 = vld [vmem:[%s1849_s24 + $0x48] sm:$0xff] }
 0x337   : > { %1026 = vperm.xlu1 %1429, %v908_v2  }
 0x33f   : > { %1036 = vperm.xlu1 %1429, %v938_v25  }
 0x347   : > { %1006 = vperm.xlu1 %1429, %v848_v48  }
 0x370   : > { %v1012_v20 = vpop.permute.xlu2 %1011 }
 0x371   : > { %v972_v63 = vpop.permute.xlu1 %971  ;;  %v1057_v14 = vmul.f32 %v1496_v31, %v1012_v20 }
 0x372   : > { %v1049_v47 = vmul.f32 %v1497_v60, %v972_v63 }
 0x373   : > { %v1121_v49 = vsel %vm305_vm0, %v1057_v14, 0.0 }
 0x374   : > { %v1122_v44 = vrot.slane %v1121_v49, 4  ;;  %v1065_v50 = vsel %vm305_vm0, %v1049_v47, 0.0 }
 0x375   : > { %v1066_v62 = vrot.slane %v1065_v50, 4 }
 0x376   : > { %v1123_v18 = vadd.f32 %v1122_v44, %v1121_v49 }
 0x377   : > { %v1067_v15 = vadd.f32 %v1066_v62, %v1065_v50 }
 0x378   : > { %v1002_v53 = vpop.permute.xlu2 %1001  ;;  %v1124_v43 = vrot.slane %v1123_v18, 2 }
 0x379   : > { %v977_v54 = vpop.permute.xlu1 %976  ;;  %v1055_v35 = vmul.f32 %v1508_v57, %v1002_v53 }
 0x37a   : > { %v1050_v56 = vmul.f32 %v1499_v55, %v977_v54  ;;  %v1509_v54 = vld [vmem:[%s1849_s24 + $0x58] sm:$0xff] }
 0x37c   : > { %v1072_v40 = vsel %vm305_vm0, %v1050_v56, 0.0 }
 0x37d   : > { %v1073_v26 = vrot.slane %v1072_v40, 4 }
 0x37f   : > { %v1074_v25 = vadd.f32 %v1073_v26, %v1072_v40 }
 0x380   : > { %v1047_v30 = vpop.permute.xlu2 %1046 }
 0x381   : > { %v982_v11 = vpop.permute.xlu1 %981  ;;  %v1064_v28 = vmul.f32 %v1503_v5, %v1047_v30 }
 0x382   : > { %v1051_v9 = vmul.f32 %v1501_v3, %v982_v11 }
 0x383   : > { %v1170_v8 = vsel %vm305_vm0, %v1064_v28, 0.0 }
 0x384   : > { %v1079_v19 = vsel %vm305_vm0, %v1051_v9, 0.0  ;;  %v1171_v20 = vrot.slane %v1170_v8, 4 }
 0x385   : > { %v1080_v32 = vrot.slane %v1079_v19, 4 }
 0x386   : > { %v1172_v56 = vadd.f32 %v1171_v20, %v1170_v8  ;;  %v1511_v20 = vld [vmem:[%s1849_s24 + $0x38] sm:$0xff] }
 0x387   : > { %v1081_v49 = vadd.f32 %v1080_v32, %v1079_v19 }
 0x388   : > { %v1173_v28 = vrot.slane %v1172_v56, 2 }
 0x389   : > { %v987_v29 = vpop.permute.xlu1 %986  ;;  %v1017_v41 = vpop.permute.xlu0 %1016 }
 0x38a   : > { %v1058_v21 = vmul.f32 %v1498_v51, %v1017_v41  ;;  %v1052_v61 = vmul.f32 %v1504_v42, %v987_v29  ;;  %v1068_v29 = vrot.slane %v1067_v15, 2  ;;  %v1107_v51 = vsel %vm305_vm0, %v1055_v35, 0.0 }
 0x38c   : > { %v1128_v22 = vsel %vm305_vm0, %v1058_v21, 0.0  ;;  %v1086_v23 = vsel %vm305_vm0, %v1052_v61, 0.0  ;;  %v1075_v21 = vrot.slane %v1074_v25, 2  ;;  %v1069_v30 = vadd.f32 %v1068_v29, %v1067_v15 }
 0x38d   : > { %v1129_v52 = vrot.slane %v1128_v22, 4 }
 0x38e   : > { %v1070_v15 = vrot.slane %v1069_v30, 1 }
 0x38f   : > { %v1130_v2 = vadd.f32 %v1129_v52, %v1128_v22  ;;  %v1076_v52 = vadd.f32 %v1075_v21, %v1074_v25 }
 0x391   : > { %v992_v10 = vpop.permute.xlu1 %991  ;;  %v1032_v45 = vpop.permute.xlu0 %1031  ;;  %v1131_v41 = vrot.slane %v1130_v2, 2  ;;  %v1077_v19 = vrot.slane %v1076_v52, 1 }
 0x392   : > { %v1061_v0 = vmul.f32 %v1502_v17, %v1032_v45  ;;  %v1053_v4 = vmul.f32 %v1505_v7, %v992_v10  ;;  %v1087_v10 = vrot.slane %v1086_v23, 4  ;;  %v1082_v17 = vrot.slane %v1081_v49, 2 }
 0x393   : > { %v1132_v44 = vadd.f32 %v1131_v41, %v1130_v2 }
 0x394   : > { %v1149_v13 = vsel %vm305_vm0, %v1061_v0, 0.0  ;;  %v1093_v16 = vsel %vm305_vm0, %v1053_v4, 0.0  ;;  %v1088_v50 = vadd.f32 %v1087_v10, %v1086_v23  ;;  %v1083_v2 = vadd.f32 %v1082_v17, %v1081_v49 }
 0x395   : > { %v1150_v48 = vrot.slane %v1149_v13, 4  ;;  %v1094_v45 = vrot.slane %v1093_v16, 4  ;;  %v1133_v42 = vrot.slane %v1132_v44, 1 }
 0x396   : > { %v1089_v61 = vrot.slane %v1088_v50, 2 }
 0x397   : > { %v1151_v55 = vadd.f32 %v1150_v48, %v1149_v13  ;;  %v1134_v8 = vadd.f32 %v1133_v42, %v1132_v44 }
 0x398   : > { %v1090_v23 = vadd.f32 %v1089_v61, %v1088_v50 }
 0x399   : > { %v997_v33 = vpop.permute.xlu1 %996  ;;  %v1042_v39 = vpop.permute.xlu0 %1041  ;;  %v1152_v0 = vrot.slane %v1151_v55, 2 }
 0x39a   : > { %v1063_v46 = vmul.f32 %v1506_v12, %v1042_v39  ;;  %v1054_v27 = vmul.f32 %v1507_v38, %v997_v33  ;;  %v1125_v33 = vadd.f32 %v1124_v43, %v1123_v18  ;;  %v1510_v18 = vld [vmem:[%s1849_s24 + $0x68] sm:$0xff]  ;;  %v1174_v43 = vadd.f32 %v1173_v28, %v1172_v56 }
 0x39b   : > { %v1153_v13 = vadd.f32 %v1152_v0, %v1151_v55  ;;  %v1071_v56 = vadd.f32 %v1070_v15, %v1069_v30 }
 0x39c   : > { %v1163_v1 = vsel %vm305_vm0, %v1063_v46, 0.0  ;;  %v1100_v63 = vsel %vm305_vm0, %v1054_v27, 0.0  ;;  %v1175_v10 = vrot.slane %v1174_v43, 1 }
 0x39d   : > { %v1164_v31 = vrot.slane %v1163_v1, 4  ;;  %v1101_v60 = vrot.slane %v1100_v63, 4  ;;  %v1154_v29 = vrot.slane %v1153_v13, 1 }
 0x39f   : > { %v1165_v40 = vadd.f32 %v1164_v31, %v1163_v1  ;;  %v1102_v62 = vadd.f32 %v1101_v60, %v1100_v63  ;;  %v1091_v31 = vrot.slane %v1090_v23, 1 }
 0x3a1   : > { %v1022_v37 = vpop.permute.xlu1 %1021  ;;  %v1166_v7 = vrot.slane %v1165_v40, 2 }
 0x3a2   : > { %v1059_v58 = vmul.f32 %v1500_v59, %v1022_v37  ;;  %v1095_v37 = vadd.f32 %v1094_v45, %v1093_v16  ;;  %v1126_v59 = vrot.slane %v1125_v33, 1 }
 0x3a3   : > { %v1167_v25 = vadd.f32 %v1166_v7, %v1165_v40 }
 0x3a4   : > { %v1135_v34 = vsel %vm305_vm0, %v1059_v58, 0.0  ;;  %v1108_v58 = vrot.slane %v1107_v51, 4  ;;  %v1096_v26 = vrot.slane %v1095_v37, 2  ;;  %v1127_v57 = vadd.f32 %v1126_v59, %v1125_v33 }
 0x3a5   : > { %v1136_v6 = vrot.slane %v1135_v34, 4  ;;  %v1168_v33 = vrot.slane %v1167_v25, 1 }
 0x3a6   : > { %v1109_v46 = vadd.f32 %v1108_v58, %v1107_v51  ;;  %v1097_v35 = vadd.f32 %v1096_v26, %v1095_v37  ;;  %v1200_v45 = vsel %vm481_vm1, %v1134_v8, %v1127_v57  ;;  %v1092_v37 = vadd.f32 %v1091_v31, %v1090_v23 }
 0x3a7   : > { %v1137_v24 = vadd.f32 %v1136_v6, %v1135_v34  ;;  %v1103_v6 = vrot.slane %v1102_v62, 2 }
 0x3a8   : > { %v1110_v1 = vrot.slane %v1109_v46, 2 }
 0x3a9   : > { %v1027_v36 = vpop.permute.xlu1 %1026  ;;  %v1138_v14 = vrot.slane %v1137_v24, 2 }
 0x3aa   : > { %v1060_v11 = vmul.f32 %v1509_v54, %v1027_v36  ;;  %v1104_v36 = vadd.f32 %v1103_v6, %v1102_v62  ;;  %v1078_v54 = vadd.f32 %v1077_v19, %v1076_v52  ;;  %v1111_v44 = vadd.f32 %v1110_v1, %v1109_v46 }
 0x3ab   : > { %v1139_v39 = vadd.f32 %v1138_v14, %v1137_v24  ;;  %v1169_v62 = vadd.f32 %v1168_v33, %v1167_v25 }
 0x3ac   : > { %v1142_v53 = vsel %vm305_vm0, %v1060_v11, 0.0  ;;  %v1084_v11 = vrot.slane %v1083_v2, 1  ;;  %v1105_v51 = vrot.slane %v1104_v36, 1  ;;  %v1193_v59 = vsel %vm481_vm1, %v1078_v54, %v1071_v56 }
 0x3ad   : > { %v1143_v47 = vrot.slane %v1142_v53, 4  ;;  %v1140_v4 = vrot.slane %v1139_v39, 1  ;;  %v1112_v30 = vrot.slane %v1111_v44, 1  ;;  %vm2576_vm1 = vcmask 1047559  }
 0x3ae   : > { %v1085_v50 = vadd.f32 %v1084_v11, %v1083_v2  ;;  %v1106_v52 = vadd.f32 %v1105_v51, %v1104_v36 }
 0x3af   : > { %v1144_v22 = vadd.f32 %v1143_v47, %v1142_v53  ;;  %v1141_v16 = vadd.f32 %v1140_v4, %v1139_v39  ;;  %v1098_v53 = vrot.slane %v1097_v35, 1  ;;  %v1113_v4 = vadd.f32 %v1112_v30, %v1111_v44 }
 0x3b1   : > { %v1145_v3 = vrot.slane %v1144_v22, 2  ;;  %v1037_v9 = vpop.permute.xlu1 %1036  ;;  %v1201_v60 = vsel %vm483_vm2, %v1141_v16, %v1200_v45  ;;  %v1099_v58 = vadd.f32 %v1098_v53, %v1097_v35 }
 0x3b2   : > { %v1062_v5 = vmul.f32 %v1510_v18, %v1037_v9  ;;  %v1176_v9 = vadd.f32 %v1175_v10, %v1174_v43  ;;  %v1194_v18 = vsel %vm483_vm2, %v1085_v50, %v1193_v59  ;;  %vm2579_vm2 = vmmov %vm2575_vm13 }
 0x3b3   : > { %v1146_v34 = vadd.f32 %v1145_v3, %v1144_v22  ;;  %v1155_v22 = vadd.f32 %v1154_v29, %v1153_v13  ;;  %v1195_v28 = vsel %vm485_vm3, %v1092_v37, %v1194_v18 }
 0x3b4   : > { %v1156_v12 = vsel %vm305_vm0, %v1062_v5, 0.0 }
 0x3b5   : > { %v1147_v38 = vrot.slane %v1146_v34, 1  ;;  %v1157_v27 = vrot.slane %v1156_v12, 4 }
 0x3b7   : > { %v1158_v24 = vadd.f32 %v1157_v27, %v1156_v12  ;;  %v1148_v32 = vadd.f32 %v1147_v38, %v1146_v34  ;;  %v1196_v34 = vsel %vm2577_vm9, %v1099_v58, %v1195_v28 }
 0x3b8   : > { %v1197_v26 = vsel %vm2578_vm12, %v1106_v52, %v1196_v34 }
 0x3b9   : > { %v1159_v48 = vrot.slane %v1158_v24, 2  ;;  %v1007_v63 = vpop.permute.xlu1 %1006  ;;  %v1202_v21 = vsel %vm485_vm3, %v1148_v32, %v1201_v60  ;;  %v1198_v46 = vsel %vm2579_vm2, %v1113_v4, %v1197_v26  ;;  %vm2580_vm3 = vmmov %vm2576_vm1 }
 0x3ba   : > { %v1056_v41 = vmul.f32 %v1511_v20, %v1007_v63  ;;  %v1203_v3 = vsel %vm2573_vm10, %v1155_v22, %v1202_v21 }
 0x3bb   : > { %v1160_v14 = vadd.f32 %v1159_v48, %v1158_v24 }
 0x3bc   : > { %v1114_v47 = vsel %vm305_vm0, %v1056_v41, 0.0 }
 0x3bd   : > { %v1161_v49 = vrot.slane %v1160_v14, 1  ;;  %v1115_v55 = vrot.slane %v1114_v47, 4 }
 0x3bf   : > { %v1162_v40 = vadd.f32 %v1161_v49, %v1160_v14  ;;  %v1116_v39 = vadd.f32 %v1115_v55, %v1114_v47 }
 0x3c1   : > { %v1204_v17 = vsel %vm2574_vm11, %v1162_v40, %v1203_v3  ;;  %v1117_v0 = vrot.slane %v1116_v39, 2 }
 0x3c2   : > { %v1205_v5 = vsel %vm2575_vm13, %v1169_v62, %v1204_v17 }
 0x3c3   : > { %v1206_v42 = vsel %vm2576_vm1, %v1176_v9, %v1205_v5  ;;  %v1118_v61 = vadd.f32 %v1117_v0, %v1116_v39 }
 0x3c4   : > { %1210 = vst.msk [vmem:[%s275_s19 + $0x8] sm:$0xff] %vm305_vm0, %v1206_v42 }
 0x3c5   : > { %v1119_v7 = vrot.slane %v1118_v61, 1 }
 0x3c7   : > { %v1120_v12 = vadd.f32 %v1119_v7, %v1118_v61 }
 0x3c9   : > { %v1199_v6 = vsel %vm2580_vm3, %v1120_v12, %v1198_v46 }
 0x3ca   : > { %1209 = vst.msk [vmem:[%s275_s19] sm:$0xff] %vm305_vm0, %v1199_v6 }
 0x3cb   : > { %1629 = shalt.err (!%p1626_p9)
}
 0x3cc   : > { %s1682_s2 = smov 128   ;;  %s1683_s27 = smov 8  }
 0x3cd   : > { %1369 = dma.vmem_to_hbm [thread:$0]  (%p1779_p7), %s1225_s20, 256, %s1227_s23, %s1212_s25, %s1682_s2, %s1682_s2, %s1683_s27  }
 0x3ce PF: > { %s1241_s10 = sand.u32 1, %s1664_s15   ;;  %p2581_p12 = scmp.ge.s32.totalorder %s1676_s18, 2 }
 0x3cf   : > { %s1242_s24 = scalar_lea.sflag [#allocation4], %s1241_s10 }
 0x3d0   : > { %p1383_p13 = pnand %p2581_p12, %p1744_p6 }
 0x3d2   : > { %p1384_p0 = pneg %p1383_p13 }
 0x3d4   : > { %1659 = dma.done.wait (%p1384_p0), %s1242_s24, 256  }
 0x3d5   : > { %1661 = vsyncadd (%p1384_p0), %s1242_s24, 4294967040  ;;  %s2582_s21 = sld [smem:[#allocation13_spill]]  ;;  %p20_p3 = scmp.ge.s32.totalorder %s1762_s29, 4  }
 0x3d6   : > { %s2583_s17 = sld [smem:[#allocation14_spill]]  ;;  %s2584_s15 = smov %s1668_s16 }
 0x3d7   : > { %s2586_s18 = smov %s1762_s29  ;;  %22 = sbr.rel (!%p20_p3) target bundleno = 9 (0x9), region = 98 }
 0x3db   : > { %s2585_s16 = smov %s2582_s21 }
 0x3dc   :  { %1248 = vsyncpa [#allocation3], 1 }
 0x3dd   :  { %1250 = vsyncpa [#allocation3 + $0x1], 1 }
 0x3de   :  { %1251 = vsyncpa [#allocation6], 1 }
 0x3df   :  { %1253 = vsyncpa [#allocation6 + $0x1], 1 }
 0x3e0   :  { %1254 = vsyncpa [#allocation4], 1 }
 0x3e1   :  { %1256 = vsyncpa [#allocation4 + $0x1], 1 }

</bundles_post_ra>
